<compile_context>
chip_gen: v7x
topology: tpu7x:2x2x1
jax: 0.10.0
libtpu: 0.0.40
codegen_flags: <defaults>
</compile_context>

<pallas_src>
import jax
import jax.numpy as jnp
from jax.experimental import pallas as pl
from jax.experimental.pallas import tpu as pltpu

n_embd = 256
hidden = 4 * n_embd
dropout = 0.2  # identity at inference


def _round_up(x, m):
    return ((x + m - 1) // m) * m


def ffn_kernel(x_ref, w1_ref, b1_ref, w2_ref, b2_ref, o_ref):
    # x_ref: (tm, C) f32, w1_ref: (C, 4C) bf16, b1_ref: (1, 4C) f32,
    # w2_ref: (4C, C) bf16, b2_ref: (1, C) f32, o_ref: (tm, C) f32
    x_bf16 = x_ref[...].astype(jnp.bfloat16)          # VPU cast, hidden under MXU
    h = jnp.dot(x_bf16, w1_ref[...], preferred_element_type=jnp.float32)
    h = jnp.maximum(h + b1_ref[...], 0.0)              # bias + ReLU in f32
    y = jnp.dot(h.astype(jnp.bfloat16), w2_ref[...],   # bf16 MXU, f32 acc
                preferred_element_type=jnp.float32)
    y = y + b2_ref[...]
    o_ref[...] = y.astype(o_ref.dtype)                 # Dropout(eval) == identity


def feed_forward(x, w1, b1, w2, b2, *, tm=1024):
    """x: (B, T, C) float32 -> (B, T, C) float32.

    w1: (C, 4C), w2: (4C, C) -- ideally already bfloat16 (see prepare_params);
    b1: (1, 4C), b2: (1, C) float32.
    """
    B, T, C = x.shape
    M = B * T
    H = w1.shape[1]

    # One-time-style casts: no-ops if params were already prepared in bf16/f32.
    if w1.dtype != jnp.bfloat16:
        w1 = w1.astype(jnp.bfloat16)
    if w2.dtype != jnp.bfloat16:
        w2 = w2.astype(jnp.bfloat16)
    b1 = b1.astype(jnp.float32)
    b2 = b2.astype(jnp.float32)

    # Row tile: 128-aligned, big enough to amortize per-step pipeline overhead,
    # but capped so the grid has >= 2 steps for larger M (v7x has 2 TCs).
    if M <= 128:
        tm_eff = 128
    else:
        tm_eff = min(tm, _round_up((M + 1) // 2, 128))
    M_pad = _round_up(M, tm_eff)

    x2 = x.reshape(M, C)            # stays f32; cast happens inside the kernel
    if M_pad != M:                  # only the ragged-tail case pays a pad pass
        x2 = jnp.pad(x2, ((0, M_pad - M), (0, 0)))

    grid = (M_pad // tm_eff,)

    # VMEM estimate: double-buffered x/out f32 tiles, single-buffered bf16
    # weights (Buffered(1)), f32 hidden intermediate, biases.
    vmem_est = (2 * tm_eff * C * 4          # x tiles
                + 2 * tm_eff * C * 4        # out tiles
                + 2 * C * H * 2             # W1 + W2, bf16, single-buffered
                + (H + C) * 4               # biases
                + tm_eff * H * 4)           # f32 hidden intermediate
    vmem_limit = int(vmem_est * 1.5) if vmem_est > 12 * 1024 * 1024 else None

    cost = pl.CostEstimate(
        flops=4 * M_pad * C * H,                                  # two matmuls
        transcendentals=0,
        bytes_accessed=(M_pad * C * 4            # x read (f32)
                        + M_pad * C * 4          # out write (f32)
                        + 2 * C * H * 2          # bf16 weights
                        + (H + C) * 4),          # biases
    )

    out = pl.pallas_call(
        ffn_kernel,
        out_shape=jax.ShapeDtypeStruct((M_pad, C), jnp.float32),
        grid=grid,
        in_specs=[
            pl.BlockSpec((tm_eff, C), lambda i: (i, 0)),                 # x tile
            pl.BlockSpec((C, H), lambda i: (0, 0),
                         pipeline_mode=pl.Buffered(1)),                  # W1 (resident)
            pl.BlockSpec((1, H), lambda i: (0, 0),
                         pipeline_mode=pl.Buffered(1)),                  # b1
            pl.BlockSpec((H, C), lambda i: (0, 0),
                         pipeline_mode=pl.Buffered(1)),                  # W2 (resident)
            pl.BlockSpec((1, C), lambda i: (0, 0),
                         pipeline_mode=pl.Buffered(1)),                  # b2
        ],
        out_specs=pl.BlockSpec((tm_eff, C), lambda i: (i, 0)),
        compiler_params=pltpu.CompilerParams(
            dimension_semantics=("parallel",),      # megacore shard on v7x
            vmem_limit_bytes=vmem_limit),
        cost_estimate=cost,
    )(x2, w1, b1, w2, b2)
    return out[:M].reshape(B, T, C)


def init_params(key):
    """Deterministic nn.Linear-style init: U(-1/sqrt(fan_in), 1/sqrt(fan_in))."""
    k1, k2, k3, k4 = jax.random.split(key, 4)
    bound1 = 1.0 / (n_embd ** 0.5)
    bound2 = 1.0 / (hidden ** 0.5)
    w1 = jax.random.uniform(k1, (n_embd, hidden), jnp.float32, -bound1, bound1)
    b1 = jax.random.uniform(k2, (1, hidden), jnp.float32, -bound1, bound1)
    w2 = jax.random.uniform(k3, (hidden, n_embd), jnp.float32, -bound2, bound2)
    b2 = jax.random.uniform(k4, (1, n_embd), jnp.float32, -bound2, bound2)
    return w1, b1, w2, b2


def prepare_params(w1, b1, w2, b2):
    """One-time param setup: store matmul weights in bf16, biases in f32."""
    return (w1.astype(jnp.bfloat16), b1.astype(jnp.float32),
            w2.astype(jnp.bfloat16), b2.astype(jnp.float32))


if __name__ == "__main__":
    key = jax.random.PRNGKey(0)
    kx, kp = jax.random.split(key)
    B, T = 2, 8
    x = jax.random.normal(kx, (B, T, n_embd), jnp.float32)
    w1f, b1f, w2f, b2f = init_params(kp)
    w1, b1, w2, b2 = prepare_params(w1f, b1f, w2f, b2f)   # bf16 weights, once

    y = feed_forward(x, w1, b1, w2, b2)
    jax.block_until_ready(y)

    # Reference mirroring the kernel numerics: bf16-quantized x/weights/hidden,
    # f32 accumulation, eval-mode dropout == identity.
    xb = x.reshape(-1, n_embd).astype(jnp.bfloat16).astype(jnp.float32)
    w1b = w1f.astype(jnp.bfloat16).astype(jnp.float32)
    w2b = w2f.astype(jnp.bfloat16).astype(jnp.float32)
    h = jnp.maximum(xb @ w1b + b1f, 0.0)
    hb = h.astype(jnp.bfloat16).astype(jnp.float32)
    ref = (hb @ w2b + b2f).reshape(B, T, n_embd)

    assert y.shape == (B, T, n_embd)
    assert y.dtype == jnp.float32
    assert jnp.allclose(y, ref, atol=1e-2, rtol=1e-2)

    print("KERNEL_OK")
</pallas_src>

<mosaic_0001>
module attributes {stable_mosaic.version = 11 : i64} {
  func.func @ffn_kernel(%arg0: i32, %arg1: memref<128x256xf32, #tpu.memory_space<vmem>>, %arg2: memref<256x1024xbf16, #tpu.memory_space<vmem>>, %arg3: memref<1x1024xf32, #tpu.memory_space<vmem>>, %arg4: memref<1024x256xbf16, #tpu.memory_space<vmem>>, %arg5: memref<1x256xf32, #tpu.memory_space<vmem>>, %arg6: memref<128x256xf32, #tpu.memory_space<vmem>>) attributes {dimension_semantics = [#tpu.dimension_semantics<parallel>], iteration_bounds = array<i64: 1>, scalar_prefetch = 0 : i64, scratch_operands = 0 : i64, tpu.core_type = #tpu.core_type<tc>, window_params = [{transform_indices = @transform_0, window_bounds = array<i64: 128, 256>}, {pipeline_mode = #tpu.pipeline_mode<synchronous>, transform_indices = @transform_1, window_bounds = array<i64: 256, 1024>}, {pipeline_mode = #tpu.pipeline_mode<synchronous>, transform_indices = @transform_2, window_bounds = array<i64: 1, 1024>}, {pipeline_mode = #tpu.pipeline_mode<synchronous>, transform_indices = @transform_3, window_bounds = array<i64: 1024, 256>}, {pipeline_mode = #tpu.pipeline_mode<synchronous>, transform_indices = @transform_4, window_bounds = array<i64: 1, 256>}, {transform_indices = @transform_5, window_bounds = array<i64: 128, 256>}]} {
    %c0 = arith.constant 0 : index
    %c0_0 = arith.constant 0 : index
    %0 = vector.load %arg1[%c0, %c0_0] : memref<128x256xf32, #tpu.memory_space<vmem>>, vector<128x256xf32>
    %1 = arith.truncf %0 : vector<128x256xf32> to vector<128x256xbf16>
    %c0_1 = arith.constant 0 : index
    %c0_2 = arith.constant 0 : index
    %2 = vector.load %arg2[%c0_1, %c0_2] : memref<256x1024xbf16, #tpu.memory_space<vmem>>, vector<256x1024xbf16>
    %cst = arith.constant dense<0.000000e+00> : vector<128x1024xf32>
    %3 = tpu.matmul %1, %2, %cst {dimension_numbers = #tpu.dot_dimension_numbers<[1], [0], [0], [1], [0, 0, 1, 1], [], []>} : vector<128x256xbf16>, vector<256x1024xbf16>, vector<128x1024xf32> -> vector<128x1024xf32>
    %c0_3 = arith.constant 0 : index
    %c0_4 = arith.constant 0 : index
    %4 = vector.load %arg3[%c0_3, %c0_4] : memref<1x1024xf32, #tpu.memory_space<vmem>>, vector<1x1024xf32>
    %5 = vector.broadcast %4 : vector<1x1024xf32> to vector<128x1024xf32>
    %6 = arith.addf %3, %5 : vector<128x1024xf32>
    %cst_5 = arith.constant 0.000000e+00 : f32
    %7 = vector.broadcast %cst_5 : f32 to vector<128x1024xf32>
    %8 = arith.maximumf %6, %7 : vector<128x1024xf32>
    %9 = arith.truncf %8 : vector<128x1024xf32> to vector<128x1024xbf16>
    %c0_6 = arith.constant 0 : index
    %c0_7 = arith.constant 0 : index
    %10 = vector.load %arg4[%c0_6, %c0_7] : memref<1024x256xbf16, #tpu.memory_space<vmem>>, vector<1024x256xbf16>
    %cst_8 = arith.constant dense<0.000000e+00> : vector<128x256xf32>
    %11 = tpu.matmul %9, %10, %cst_8 {dimension_numbers = #tpu.dot_dimension_numbers<[1], [0], [0], [1], [0, 0, 1, 1], [], []>} : vector<128x1024xbf16>, vector<1024x256xbf16>, vector<128x256xf32> -> vector<128x256xf32>
    %c0_9 = arith.constant 0 : index
    %c0_10 = arith.constant 0 : index
    %12 = vector.load %arg5[%c0_9, %c0_10] : memref<1x256xf32, #tpu.memory_space<vmem>>, vector<1x256xf32>
    %13 = vector.broadcast %12 : vector<1x256xf32> to vector<128x256xf32>
    %14 = arith.addf %11, %13 : vector<128x256xf32>
    %c0_11 = arith.constant 0 : index
    %c0_12 = arith.constant 0 : index
    %15 = vector.load %arg6[%c0_11, %c0_12] : memref<128x256xf32, #tpu.memory_space<vmem>>, vector<128x256xf32>
    tpu.vector_store %arg6[%c0_11, %c0_12], %14 {strides = array<i32>} : memref<128x256xf32, #tpu.memory_space<vmem>>, vector<128x256xf32>,
    return
  }
  func.func @transform_0(%arg0: i32) -> (i32, i32) {
    %c0_i32 = arith.constant 0 : i32
    %c0_i32_0 = arith.constant 0 : i32
    return %arg0, %c0_i32 : i32, i32
  }
  func.func @transform_1(%arg0: i32) -> (i32, i32) {
    %c0_i32 = arith.constant 0 : i32
    %c0_i32_0 = arith.constant 0 : i32
    %c0_i32_1 = arith.constant 0 : i32
    return %c0_i32, %c0_i32_0 : i32, i32
  }
  func.func @transform_2(%arg0: i32) -> (i32, i32) {
    %c0_i32 = arith.constant 0 : i32
    %c0_i32_0 = arith.constant 0 : i32
    %c0_i32_1 = arith.constant 0 : i32
    return %c0_i32, %c0_i32_0 : i32, i32
  }
  func.func @transform_3(%arg0: i32) -> (i32, i32) {
    %c0_i32 = arith.constant 0 : i32
    %c0_i32_0 = arith.constant 0 : i32
    %c0_i32_1 = arith.constant 0 : i32
    return %c0_i32, %c0_i32_0 : i32, i32
  }
  func.func @transform_4(%arg0: i32) -> (i32, i32) {
    %c0_i32 = arith.constant 0 : i32
    %c0_i32_0 = arith.constant 0 : i32
    %c0_i32_1 = arith.constant 0 : i32
    return %c0_i32, %c0_i32_0 : i32, i32
  }
  func.func @transform_5(%arg0: i32) -> (i32, i32) {
    %c0_i32 = arith.constant 0 : i32
    %c0_i32_0 = arith.constant 0 : i32
    return %arg0, %c0_i32 : i32, i32
  }
}

</mosaic_0001>

<bundles_post_ra>
// kernel: tpu_custom_call.1
= control target key start
LH: loop header
LB: loop body
LE: loop exit
PB: predicated region body
PF: predicated region fallthrough
CT: control target
= control target key end

     0   :  { %10 = vsyncpa [#allocation3], 0  ;;  %s3984_s0 = inlined_call_operand.hbm [shape: f32[128,256], index: 0, kind: input, shape index: {}]   ;;  %s3985_s1 = inlined_call_operand.hbm [shape: bf16[256,1024], index: 1, kind: input, shape index: {}]   ;;  %s3986_s2 = inlined_call_operand.hbm [shape: f32[1,1024], index: 2, kind: input, shape index: {}]   ;;  %s3987_s3 = inlined_call_operand.hbm [shape: bf16[1024,256], index: 3, kind: input, shape index: {}]   ;;  %s3988_s4 = inlined_call_operand.vmem [shape: f32[1,256], index: 4, kind: input, shape index: {}]   ;;  %s3989_s5 = inlined_call_operand.hbm [shape: f32[128,256], index: 5, kind: output, shape index: {}]  }
   0x1   :  { %11 = vsyncpa [#allocation6], 0 }
   0x2   :  { %12 = vsyncpa [#allocation9], 0 }
   0x3   :  { %13 = vsyncpa [#allocation4], 0  ;;  %s3565_s18 = smov [#allocation5]   ;;  %s3447_s22 = scalar_lea.hbm %s3985_s1, 16384 }
   0x4   :  { %s31_s19 = sshll.u32 %s3565_s18, 4  ;;  %p3448_p0 = scmp.ne.s32.totalorder %s3985_s1, %s3447_s22  ;;  %s32_s19 = int_to_ptr.vmem [resolvable:$true] %s31_s19 }
   0x5   :  { %p3451_p1 = scmp.lt.u32.totalorder %s3447_s22, %s3985_s1 }
   0x7   :  { %p3453_p2 = pnand %p3451_p1, %p3448_p0 }
   0x9   :  { %3456 = shalt.err (!%p3453_p2)
}
   0xa   :  { %s3457_s27 = scalar_lea.vmem %s32_s19, 16384  ;;  %p3462_p4 = scmp.lt.s32.totalorder %s32_s19, %s32_s19 }
   0xb   :  { %p3458_p3 = scmp.ne.s32.totalorder %s32_s19, %s3457_s27  ;;  %p3463_p5 = scmp.lt.s32.totalorder %s3457_s27, %s3457_s27 }
   0xd   :  { %p3464_p6 = por %p3463_p5, %p3462_p4 }
   0xf   :  { %p3465_p7 = pnand %p3464_p6, %p3458_p3 }
  0x11   :  { %3468 = shalt.err (!%p3465_p7)
}
  0x12   :  { %s3566_s28 = smov 512   ;;  %s3567_s29 = smov 32  }
  0x13   :  { %37 = dma.hbm_to_vmem [thread:$0]  %s3985_s1, 16384, %s32_s19, [#allocation6], %s3566_s28, %s3566_s28, %s3567_s29  }
  0x14   :  { %s3568_s7 = smov [#allocation2]   ;;  %s3469_s11 = scalar_lea.hbm %s3984_s0, 4096 }
  0x15   :  { %s19_s8 = sshll.u32 %s3568_s7, 4  ;;  %p3470_p8 = scmp.ne.s32.totalorder %s3984_s0, %s3469_s11  ;;  %s20_s8 = int_to_ptr.vmem [resolvable:$true] %s19_s8 }
  0x16   :  { %p3473_p9 = scmp.lt.u32.totalorder %s3469_s11, %s3984_s0 }
  0x18   :  { %p3475_p10 = pnand %p3473_p9, %p3470_p8 }
  0x1a   :  { %3478 = shalt.err (!%p3475_p10)
}
  0x1b   :  { %s3479_s16 = scalar_lea.vmem %s20_s8, 4096  ;;  %p3484_p12 = scmp.lt.s32.totalorder %s20_s8, %s20_s8 }
  0x1c   :  { %p3480_p11 = scmp.ne.s32.totalorder %s20_s8, %s3479_s16  ;;  %p3485_p13 = scmp.lt.s32.totalorder %s3479_s16, %s3479_s16 }
  0x1e   :  { %p3486_p0 = por %p3485_p13, %p3484_p12 }
  0x20   :  { %p3487_p1 = pnand %p3486_p0, %p3480_p11 }
  0x22   :  { %3490 = shalt.err (!%p3487_p1)
}
  0x23   :  { %s3569_s1 = smov 256   ;;  %s3570_s17 = smov 16  }
  0x24   :  { %25 = dma.hbm_to_vmem [thread:$0]  %s3984_s0, 4096, %s20_s8, [#allocation3], %s3569_s1, %s3569_s1, %s3570_s17  }
  0x25   :  { %s3571_s20 = smov [#allocation7]   ;;  %s3572_s22 = smov [#allocation8]  }
  0x26   :  { %s44_s21 = sshll.u32 %s3571_s20, 4  ;;  %s53_s23 = sshll.u32 %s3572_s22, 4  ;;  %s45_s21 = int_to_ptr.vmem [resolvable:$true] %s44_s21  ;;  %s3633_s23 = int_to_ptr.vmem [resolvable:$true] %s53_s23 }
  0x27   :  { %s3491_s26 = scalar_lea.hbm %s3986_s2, 128 }
  0x28   :  { %p3492_p2 = scmp.ne.s32.totalorder %s3986_s2, %s3491_s26  ;;  %p3495_p3 = scmp.lt.u32.totalorder %s3491_s26, %s3986_s2 }
  0x2a   :  { %p3497_p4 = pnand %p3495_p3, %p3492_p2 }
  0x2c   :  { %3500 = shalt.err (!%p3497_p4)
}
  0x2d   :  { %s3501_s0 = scalar_lea.vmem %s45_s21, 128  ;;  %p3506_p6 = scmp.lt.s32.totalorder %s45_s21, %s45_s21 }
  0x2e   :  { %p3502_p5 = scmp.ne.s32.totalorder %s45_s21, %s3501_s0  ;;  %p3507_p7 = scmp.lt.s32.totalorder %s3501_s0, %s3501_s0 }
  0x30   :  { %p3508_p8 = por %p3507_p7, %p3506_p6 }
  0x32   :  { %p3509_p9 = pnand %p3508_p8, %p3502_p5 }
  0x34   :  { %3512 = shalt.err (!%p3509_p9)
}
  0x35   :  { %47 = dma.hbm_to_vmem [thread:$0]  %s3986_s2, 128, %s45_s21, [#allocation6]  }
  0x36   :  { %s3513_s10 = scalar_lea.hbm %s3987_s3, 16384 }
  0x37   :  { %p3514_p10 = scmp.ne.s32.totalorder %s3987_s3, %s3513_s10  ;;  %p3517_p11 = scmp.lt.u32.totalorder %s3513_s10, %s3987_s3 }
  0x39   :  { %p3519_p12 = pnand %p3517_p11, %p3514_p10 }
  0x3b   :  { %3522 = shalt.err (!%p3519_p12)
}
  0x3c   :  { %s3523_s15 = scalar_lea.vmem %s3633_s23, 16384  ;;  %p3528_p0 = scmp.lt.s32.totalorder %s3633_s23, %s3633_s23 }
  0x3d   :  { %p3524_p13 = scmp.ne.s32.totalorder %s3633_s23, %s3523_s15  ;;  %p3529_p1 = scmp.lt.s32.totalorder %s3523_s15, %s3523_s15 }
  0x3f   :  { %p3530_p2 = por %p3529_p1, %p3528_p0 }
  0x41   :  { %p3531_p3 = pnand %p3530_p2, %p3524_p13 }
  0x43   :  { %3534 = shalt.err (!%p3531_p3)
}
  0x44   :  { %s3573_s2 = smov 128   ;;  %s3574_s16 = smov 8  }
  0x45   :  { %59 = dma.hbm_to_vmem [thread:$0]  %s3987_s3, 16384, %s3633_s23, [#allocation9], %s3573_s2, %s3573_s2, %s3574_s16  }
  0x46   :  { %3557 = dma.done.wait [#allocation3], 4096  }
  0x47   :  { %3558 = vsyncadd [#allocation3], 4294963200 }
  0x48   :  { %3559 = dma.done.wait [#allocation6], 16512  }
  0x49   :  { %3560 = vsyncadd [#allocation6], 4294950784 }
  0x4a   :  { %3561 = dma.done.wait [#allocation9], 16384  }
  0x4b   :  { %3562 = vsyncadd [#allocation9], 4294950912  ;;  %v122_v0 = vld [vmem:[#allocation5] sm:$0xff]  ;;  %v75_v17 = vld [vmem:[#allocation2 + $0x8] sm:$0xff] }
  0x4c   :  { %v126_v1 = vld [vmem:[#allocation5 + $0x20] sm:$0xff]  ;;  %v77_v18 = vld [vmem:[#allocation2 + $0x18] sm:$0xff] }
  0x4d   :  { %v130_v2 = vld [vmem:[#allocation5 + $0x40] sm:$0xff]  ;;  %v2860_v3 = vcombine.high %v122_v0, %v126_v1  ;;  %v2859_v4 = vcombine.low %v122_v0, %v126_v1  ;;  %v3664_v20 = vpack.c.bf16 %v77_v18, %v75_v17  ;;  %v123_v1 = vld [vmem:[#allocation5 + $0x8] sm:$0xff] }
  0x4e   :  { %v134_v5 = vld [vmem:[#allocation5 + $0x60] sm:$0xff] }
  0x4f   :  { %v2868_v6 = vcombine.high %v130_v2, %v134_v5  ;;  %v138_v7 = vld [vmem:[#allocation5 + $0x80] sm:$0xff]  ;;  %932 = vmatprep.subr.bf16.mxu1 %v2860_v3  ;;  %v2867_v9 = vcombine.low %v130_v2, %v134_v5  ;;  %964 = vmatprep.mubr.bf16.mxu1 %v3664_v20  ;;  %v127_v2 = vld [vmem:[#allocation5 + $0x28] sm:$0xff]  ;;  %v76_v5 = vld [vmem:[#allocation2 + $0x10] sm:$0xff] }
  0x50   :  { %v142_v8 = vld [vmem:[#allocation5 + $0xa0] sm:$0xff]  ;;  %933 = vmatpush1.bf16.msra.mxu1 %v2859_v4 }
  0x51   :  { %934 = vmatprep.subr.bf16.mxu1 %v2868_v6  ;;  %v2876_v10 = vcombine.high %v138_v7, %v142_v8  ;;  %v146_v11 = vld [vmem:[#allocation5 + $0xc0] sm:$0xff]  ;;  %v2875_v13 = vcombine.low %v138_v7, %v142_v8  ;;  %v131_v7 = vld [vmem:[#allocation5 + $0x48] sm:$0xff] }
  0x52   :  { %v150_v12 = vld [vmem:[#allocation5 + $0xe0] sm:$0xff]  ;;  %v135_v8 = vld [vmem:[#allocation5 + $0x68] sm:$0xff] }
  0x53   :  { %v2884_v14 = vcombine.high %v146_v11, %v150_v12  ;;  %v154_v15 = vld [vmem:[#allocation5 + $0x100] sm:$0xff]  ;;  %v2883_v19 = vcombine.low %v146_v11, %v150_v12  ;;  %v2862_v11 = vcombine.high %v123_v1, %v127_v2  ;;  %v2870_v17 = vcombine.high %v131_v7, %v135_v8 }
  0x54   :  { %935 = vmatpush1.bf16.msra.mxu1 %v2867_v9  ;;  %v158_v16 = vld [vmem:[#allocation5 + $0x120] sm:$0xff]  ;;  %v79_v9 = vld [vmem:[#allocation2 + $0x28] sm:$0xff] }
  0x55   :  { %936 = vmatprep.subr.bf16.mxu1 %v2876_v10  ;;  %v2892_v21 = vcombine.high %v154_v15, %v158_v16  ;;  %v162_v22 = vld [vmem:[#allocation5 + $0x140] sm:$0xff]  ;;  %v2891_v24 = vcombine.low %v154_v15, %v158_v16  ;;  %v81_v10 = vld [vmem:[#allocation2 + $0x38] sm:$0xff]  ;;  %v139_v15 = vld [vmem:[#allocation5 + $0x88] sm:$0xff] }
  0x56   :  { %v166_v23 = vld [vmem:[#allocation5 + $0x160] sm:$0xff]  ;;  %v143_v16 = vld [vmem:[#allocation5 + $0xa8] sm:$0xff] }
  0x57   :  { %v2900_v25 = vcombine.high %v162_v22, %v166_v23  ;;  %v170_v26 = vld [vmem:[#allocation5 + $0x180] sm:$0xff]  ;;  %v2899_v28 = vcombine.low %v162_v22, %v166_v23  ;;  %v147_v22 = vld [vmem:[#allocation5 + $0xc8] sm:$0xff] }
  0x58   :  { %937 = vmatpush1.bf16.msra.mxu1 %v2875_v13  ;;  %v174_v27 = vld [vmem:[#allocation5 + $0x1a0] sm:$0xff]  ;;  %v2861_v13 = vcombine.low %v123_v1, %v127_v2  ;;  %v151_v23 = vld [vmem:[#allocation5 + $0xe8] sm:$0xff]  ;;  %v97_v2 = vld [vmem:[#allocation2 + $0xb8] sm:$0xff] }
  0x59   :  { %938 = vmatprep.subr.bf16.mxu1 %v2884_v14  ;;  %v2908_v29 = vcombine.high %v170_v26, %v174_v27  ;;  %v178_v30 = vld [vmem:[#allocation5 + $0x1c0] sm:$0xff]  ;;  %v2907_v32 = vcombine.low %v170_v26, %v174_v27  ;;  %v3669_v14 = vpack.c.bf16 %v81_v10, %v79_v9  ;;  %v2878_v26 = vcombine.high %v139_v15, %v143_v16  ;;  %v95_v1 = vld [vmem:[#allocation2 + $0xa8] sm:$0xff] }
  0x5a   :  { %v182_v31 = vld [vmem:[#allocation5 + $0x1e0] sm:$0xff]  ;;  %v3256_v9 = vld [vmem:[#allocation8] ss:$8 sps:$4 sm:$0xff]  }
  0x5b   :  { %v2916_v33 = vcombine.high %v178_v30, %v182_v31  ;;  %v186_v34 = vld [vmem:[#allocation5 + $0x200] sm:$0xff]  ;;  %v2915_v36 = vcombine.low %v178_v30, %v182_v31  ;;  %v155_v30 = vld [vmem:[#allocation5 + $0x108] sm:$0xff] }
  0x5c   :  { %939 = vmatpush1.bf16.msra.mxu1 %v2883_v19  ;;  %v190_v35 = vld [vmem:[#allocation5 + $0x220] sm:$0xff]  ;;  %v80_v19 = vld [vmem:[#allocation2 + $0x30] sm:$0xff]  ;;  %v159_v31 = vld [vmem:[#allocation5 + $0x128] sm:$0xff] }
  0x5d   :  { %940 = vmatprep.subr.bf16.mxu1 %v2892_v21  ;;  %v2924_v37 = vcombine.high %v186_v34, %v190_v35  ;;  %v194_v38 = vld [vmem:[#allocation5 + $0x240] sm:$0xff]  ;;  %v2923_v40 = vcombine.low %v186_v34, %v190_v35  ;;  %v2869_v21 = vcombine.low %v131_v7, %v135_v8  ;;  %v84_v34 = vld [vmem:[#allocation2 + $0x50] sm:$0xff]  ;;  %v2885_v35 = vcombine.low %v147_v22, %v151_v23 }
  0x5e   :  { %v198_v39 = vld [vmem:[#allocation5 + $0x260] sm:$0xff]  ;;  %v3693_v8 = vpack.c.bf16 %v97_v2, %v95_v1  ;;  %v247_v1 = vld [vmem:[#allocation5 + $0x3e8] sm:$0xff] }
  0x5f   :  { %v2932_v41 = vcombine.high %v194_v38, %v198_v39  ;;  %v202_v42 = vld [vmem:[#allocation5 + $0x280] sm:$0xff]  ;;  %v2931_v44 = vcombine.low %v194_v38, %v198_v39  ;;  %v87_v38 = vld [vmem:[#allocation2 + $0x68] sm:$0xff]  ;;  %v89_v39 = vld [vmem:[#allocation2 + $0x78] sm:$0xff] }
  0x60   :  { %941 = vmatpush1.bf16.msra.mxu1 %v2891_v24  ;;  %v206_v43 = vld [vmem:[#allocation5 + $0x2a0] sm:$0xff]  ;;  %v83_v24 = vld [vmem:[#allocation2 + $0x48] sm:$0xff] }
  0x61   :  { %942 = vmatprep.subr.bf16.mxu1 %v2900_v25  ;;  %v2940_v45 = vcombine.high %v202_v42, %v206_v43  ;;  %v210_v46 = vld [vmem:[#allocation5 + $0x2c0] sm:$0xff]  ;;  %v2939_v48 = vcombine.low %v202_v42, %v206_v43  ;;  %v85_v25 = vld [vmem:[#allocation2 + $0x58] sm:$0xff]  ;;  %v2893_v42 = vcombine.low %v155_v30, %v159_v31  ;;  %v3681_v43 = vpack.c.bf16 %v89_v39, %v87_v38  ;;  %v100_v39 = vld [vmem:[#allocation2 + $0xd0] sm:$0xff] }
  0x62   :  { %v214_v47 = vld [vmem:[#allocation5 + $0x2e0] sm:$0xff] }
  0x63   :  { %v218_v49 = vld [vmem:[#allocation5 + $0x300] sm:$0xff]  ;;  %v2948_v51 = vcombine.high %v210_v46, %v214_v47  ;;  %v2947_v52 = vcombine.low %v210_v46, %v214_v47 }
  0x64   :  { %943 = vmatpush1.bf16.msra.mxu1 %v2899_v28  ;;  %v222_v50 = vld [vmem:[#allocation5 + $0x320] sm:$0xff]  ;;  %v2877_v28 = vcombine.low %v139_v15, %v143_v16 }
  0x65   :  { %944 = vmatprep.subr.bf16.mxu1 %v2908_v29  ;;  %v226_v53 = vld [vmem:[#allocation5 + $0x340] sm:$0xff]  ;;  %v2956_v55 = vcombine.high %v218_v49, %v222_v50  ;;  %v2955_v56 = vcombine.low %v218_v49, %v222_v50  ;;  %v3675_v29 = vpack.c.bf16 %v85_v25, %v83_v24  ;;  %v179_v50 = vld [vmem:[#allocation5 + $0x1c8] sm:$0xff] }
  0x66   :  { %v230_v54 = vld [vmem:[#allocation5 + $0x360] sm:$0xff]  ;;  %v211_v24 = vld [vmem:[#allocation5 + $0x2c8] sm:$0xff] }
  0x67   :  { %v234_v57 = vld [vmem:[#allocation5 + $0x380] sm:$0xff]  ;;  %v2964_v59 = vcombine.high %v226_v53, %v230_v54  ;;  %v2963_v60 = vcombine.low %v226_v53, %v230_v54  ;;  %v93_v53 = vld [vmem:[#allocation2 + $0x98] sm:$0xff]  ;;  %v215_v25 = vld [vmem:[#allocation5 + $0x2e8] sm:$0xff] }
  0x68   :  { %945 = vmatpush1.bf16.msra.mxu1 %v2907_v32  ;;  %v238_v58 = vld [vmem:[#allocation5 + $0x3a0] sm:$0xff]  ;;  %v2886_v32 = vcombine.high %v147_v22, %v151_v23  ;;  %v99_v22 = vld [vmem:[#allocation2 + $0xc8] sm:$0xff]  ;;  %v101_v23 = vld [vmem:[#allocation2 + $0xd8] sm:$0xff] }
  0x69   :  { %946 = vmatprep.subr.bf16.mxu1 %v2916_v33  ;;  %v242_v61 = vld [vmem:[#allocation5 + $0x3c0] sm:$0xff]  ;;  %v2972_v63 = vcombine.high %v234_v57, %v238_v58  ;;  %v2971_v0 = vcombine.low %v234_v57, %v238_v58 }
  0x6a   :  { %v246_v62 = vld [vmem:[#allocation5 + $0x3e0] sm:$0xff] }
  0x6b   :  { %v2980_v3 = vcombine.high %v242_v61, %v246_v62  ;;  %v74_v4 = vld [vmem:[#allocation2] sm:$0xff]  ;;  %v2979_v6 = vcombine.low %v242_v61, %v246_v62 }
  0x6c   :  { %947 = vmatpush1.bf16.msra.mxu1 %v2915_v36  ;;  %v3667_v12 = vpack.c.bf16 %v76_v5, %v74_v4  ;;  %v78_v18 = vld [vmem:[#allocation2 + $0x20] sm:$0xff]  ;;  %v163_v36 = vld [vmem:[#allocation5 + $0x148] sm:$0xff] }
  0x6d   :  { %948 = vmatprep.subr.bf16.mxu1 %v2924_v37  ;;  %v3673_v27 = vpack.c.bf16 %v80_v19, %v78_v18  ;;  %v82_v33 = vld [vmem:[#allocation2 + $0x40] sm:$0xff]  ;;  %v167_v37 = vld [vmem:[#allocation5 + $0x168] sm:$0xff]  ;;  %v96_v18 = vld [vmem:[#allocation2 + $0xb0] sm:$0xff] }
  0x6e   :  { %v2902_v46 = vcombine.high %v163_v36, %v167_v37  ;;  %v86_v47 = vld [vmem:[#allocation2 + $0x60] sm:$0xff]  ;;  %v2901_v49 = vcombine.low %v163_v36, %v167_v37  ;;  %v199_v4 = vld [vmem:[#allocation5 + $0x268] sm:$0xff]  ;;  %v2949_v37 = vcombine.low %v211_v24, %v215_v25 }
  0x6f   :  { %v90_v62 = vld [vmem:[#allocation2 + $0x80] sm:$0xff] }
  0x70   :  { %949 = vmatpush1.bf16.msra.mxu1 %v2923_v40  ;;  %v2894_v40 = vcombine.high %v155_v30, %v159_v31  ;;  %v3257_v15 = vld [vmem:[#allocation8 + $0x14] ss:$8 sps:$4 sm:$0xff]   ;;  %v3259_v19 = vld [vmem:[#allocation8 + $0x10] ss:$8 sps:$4 sm:$0xff]   ;;  %v3699_v31 = vpack.c.bf16 %v101_v23, %v99_v22  ;;  %v3280_v22 = vld [vmem:[#allocation8 + $0x80] ss:$8 sps:$4 sm:$0xff]  }
  0x71   :  { %950 = vmatprep.subr.bf16.mxu1 %v2932_v41  ;;  %v3679_v41 = vpack.c.bf16 %v84_v34, %v82_v33  ;;  %v2950_v33 = vcombine.high %v211_v24, %v215_v25  ;;  %v219_v34 = vld [vmem:[#allocation5 + $0x308] sm:$0xff]  ;;  %v3263_v36 = vld [vmem:[#allocation8 + $0x34] ss:$8 sps:$4 sm:$0xff]   ;;  %v140_v24 = vld [vmem:[#allocation5 + $0x90] sm:$0xff] }
  0x72   :  { %v98_v38 = vld [vmem:[#allocation2 + $0xc0] sm:$0xff]  ;;  %v144_v25 = vld [vmem:[#allocation5 + $0xb0] sm:$0xff] }
  0x74   :  { %951 = vmatpush1.bf16.msra.mxu1 %v2931_v44  ;;  %v171_v44 = vld [vmem:[#allocation5 + $0x188] sm:$0xff] }
  0x75   :  { %952 = vmatprep.subr.bf16.mxu1 %v2940_v45  ;;  %v175_v45 = vld [vmem:[#allocation5 + $0x1a8] sm:$0xff] }
  0x76   :  { %v2910_v54 = vcombine.high %v171_v44, %v175_v45 }
  0x78   :  { %953 = vmatpush1.bf16.msra.mxu1 %v2939_v48  ;;  %v88_v48 = vld [vmem:[#allocation2 + $0x70] sm:$0xff] }
  0x79   :  { %954 = vmatprep.subr.bf16.mxu1 %v2948_v51  ;;  %v183_v51 = vld [vmem:[#allocation5 + $0x1e8] sm:$0xff] }
  0x7a   :  { %v2918_v58 = vcombine.high %v179_v50, %v183_v51  ;;  %v2917_v61 = vcombine.low %v179_v50, %v183_v51 }
  0x7c   :  { %955 = vmatpush1.bf16.msra.mxu1 %v2947_v52  ;;  %v91_v52 = vld [vmem:[#allocation2 + $0x88] sm:$0xff] }
  0x7d   :  { %956 = vmatprep.subr.bf16.mxu1 %v2956_v55  ;;  %v3685_v55 = vpack.c.bf16 %v88_v48, %v86_v47  ;;  %v3687_v57 = vpack.c.bf16 %v93_v53, %v91_v52  ;;  %v231_v47 = vld [vmem:[#allocation5 + $0x368] sm:$0xff]  ;;  %v3703_v48 = vpack.c.bf16 %v100_v39, %v98_v38  ;;  %v2879_v38 = vcombine.low %v140_v24, %v144_v25 }
  0x7e   :  { %v3268_v52 = vld [vmem:[#allocation8 + $0x40] ss:$8 sps:$4 sm:$0xff]  }
  0x80   :  { %957 = vmatpush1.bf16.msra.mxu1 %v2955_v56  ;;  %v2909_v56 = vcombine.low %v171_v44, %v175_v45  ;;  %v103_v44 = vld [vmem:[#allocation2 + $0xe8] sm:$0xff]  ;;  %v105_v45 = vld [vmem:[#allocation2 + $0xf8] sm:$0xff] }
  0x81   :  { %958 = vmatprep.subr.bf16.mxu1 %v2964_v59  ;;  %v187_v59 = vld [vmem:[#allocation5 + $0x208] sm:$0xff]  ;;  %v3705_v51 = vpack.c.bf16 %v105_v45, %v103_v44  ;;  %v3287_v44 = vld [vmem:[#allocation8 + $0xb4] ss:$8 sps:$4 sm:$0xff]   ;;  %v3289_v45 = vld [vmem:[#allocation8 + $0xb0] ss:$8 sps:$4 sm:$0xff]  }
  0x84   :  { %959 = vmatpush1.bf16.msra.mxu1 %v2963_v60  ;;  %v191_v60 = vld [vmem:[#allocation5 + $0x228] sm:$0xff] }
  0x85   :  { %960 = vmatprep.subr.bf16.mxu1 %v2972_v63  ;;  %v92_v63 = vld [vmem:[#allocation2 + $0x90] sm:$0xff]  ;;  %v2925_v7 = vcombine.low %v187_v59, %v191_v60 }
  0x86   :  { %v3691_v5 = vpack.c.bf16 %v92_v63, %v90_v62  ;;  %v3271_v62 = vld [vmem:[#allocation8 + $0x50] ss:$8 sps:$4 sm:$0xff]  }
  0x88   :  { %961 = vmatpush1.bf16.msra.mxu1 %v2971_v0  ;;  %v2926_v0 = vcombine.high %v187_v59, %v191_v60  ;;  %v102_v60 = vld [vmem:[#allocation2 + $0xe0] sm:$0xff] }
  0x89   :  { %962 = vmatprep.subr.bf16.mxu1 %v2980_v3  ;;  %v195_v3 = vld [vmem:[#allocation5 + $0x248] sm:$0xff] }
  0x8a   :  { %v2934_v10 = vcombine.high %v195_v3, %v199_v4  ;;  %v2933_v16 = vcombine.low %v195_v3, %v199_v4  ;;  %v3272_v3 = vld [vmem:[#allocation8 + $0x64] ss:$8 sps:$4 sm:$0xff]  }
  0x8c   :  { %963 = vmatpush1.bf16.msra.mxu1 %v2979_v6  ;;  %v3254_v6 = vld [vmem:[#allocation8 + $0x4] ss:$8 sps:$4 sm:$0xff]  }
  0x8d   :  { %1045 = vmatprep.subr.bf16.mxu1 %v2862_v11  ;;  %2356 = vmatprep.subr.bf16.mxu0 %v3254_v6  ;;  %v203_v11 = vld [vmem:[#allocation5 + $0x288] sm:$0xff] }
  0x8e   :  { %2357 = vmatpush1.bf16.msra.mxu0 %v3256_v9  ;;  %v3274_v6 = vld [vmem:[#allocation8 + $0x60] ss:$8 sps:$4 sm:$0xff]  }
  0x8f   :  { %965 = vmatmul.mubr.bf16.vlgmr.msra.gmra.mrb[0].mxu1 %v3667_v12  ;;  %2358 = vmatprep.subr.bf16.mxu0 %v3257_v15  ;;  %v124_v9 = vld [vmem:[#allocation5 + $0x10] sm:$0xff]  ;;  %v3277_v15 = vld [vmem:[#allocation8 + $0x70] ss:$8 sps:$4 sm:$0xff]  }
  0x90   :  { %1046 = vmatpush1.bf16.msra.mxu1 %v2861_v13  ;;  %974 = vmatprep.mubr.bf16.mxu1 %v3669_v14  ;;  %v207_v13 = vld [vmem:[#allocation5 + $0x2a8] sm:$0xff] }
  0x91   :  { %1047 = vmatprep.subr.bf16.mxu1 %v2870_v17  ;;  %v94_v17 = vld [vmem:[#allocation2 + $0xa0] sm:$0xff]  ;;  %v2941_v30 = vcombine.low %v203_v11, %v207_v13 }
  0x92   :  { %2359 = vmatpush1.bf16.msra.mxu0 %v3259_v19  ;;  %v3278_v19 = vld [vmem:[#allocation8 + $0x84] ss:$8 sps:$4 sm:$0xff]  }
  0x94   :  { %1048 = vmatpush1.bf16.msra.mxu1 %v2869_v21  ;;  %v2942_v21 = vcombine.high %v203_v11, %v207_v13  ;;  %v3275_v11 = vld [vmem:[#allocation8 + $0x74] ss:$8 sps:$4 sm:$0xff]  }
  0x95   :  { %1049 = vmatprep.subr.bf16.mxu1 %v2878_v26  ;;  %v3697_v26 = vpack.c.bf16 %v96_v18, %v94_v17  ;;  %v132_v17 = vld [vmem:[#allocation5 + $0x50] sm:$0xff] }
  0x96   :  { %v136_v18 = vld [vmem:[#allocation5 + $0x70] sm:$0xff] }
  0x97   :  { %975 = vmatmul.mubr.bf16.gmra.mrb[4].mxu1 %v3673_v27  ;;  %v2872_v23 = vcombine.high %v132_v17, %v136_v18 }
  0x98   :  { %1050 = vmatpush1.bf16.msra.mxu1 %v2877_v28  ;;  %984 = vmatprep.mubr.bf16.mxu1 %v3675_v29  ;;  %v3260_v28 = vld [vmem:[#allocation8 + $0x24] ss:$8 sps:$4 sm:$0xff]  }
  0x99   :  { %1051 = vmatprep.subr.bf16.mxu1 %v2886_v32  ;;  %v3262_v32 = vld [vmem:[#allocation8 + $0x20] ss:$8 sps:$4 sm:$0xff]   ;;  %2360 = vmatprep.subr.bf16.mxu0 %v3260_v28  ;;  %v3281_v28 = vld [vmem:[#allocation8 + $0x94] ss:$8 sps:$4 sm:$0xff]  }
  0x9a   :  { %2361 = vmatpush1.bf16.msra.mxu0 %v3262_v32  ;;  %v3284_v32 = vld [vmem:[#allocation8 + $0xa4] ss:$8 sps:$4 sm:$0xff]  }
  0x9b   :  { %2362 = vmatprep.subr.bf16.mxu0 %v3263_v36  ;;  %v152_v36 = vld [vmem:[#allocation5 + $0xf0] sm:$0xff] }
  0x9c   :  { %1052 = vmatpush1.bf16.msra.mxu1 %v2885_v35  ;;  %v223_v35 = vld [vmem:[#allocation5 + $0x328] sm:$0xff] }
  0x9d   :  { %1053 = vmatprep.subr.bf16.mxu1 %v2894_v40  ;;  %v3265_v40 = vld [vmem:[#allocation8 + $0x30] ss:$8 sps:$4 sm:$0xff]   ;;  %v2957_v50 = vcombine.low %v219_v34, %v223_v35 }
  0x9e   :  { %2363 = vmatpush1.bf16.msra.mxu0 %v3265_v40  ;;  %v156_v40 = vld [vmem:[#allocation5 + $0x110] sm:$0xff] }
  0x9f   :  { %985 = vmatmul.mubr.bf16.gmra.mrb[8].mxu1 %v3679_v41 }
  0xa0   :  { %1054 = vmatpush1.bf16.msra.mxu1 %v2893_v42  ;;  %994 = vmatprep.mubr.bf16.mxu1 %v3681_v43  ;;  %v2958_v42 = vcombine.high %v219_v34, %v223_v35  ;;  %v2880_v34 = vcombine.high %v140_v24, %v144_v25  ;;  %v148_v35 = vld [vmem:[#allocation5 + $0xd0] sm:$0xff] }
  0xa1   :  { %1055 = vmatprep.subr.bf16.mxu1 %v2902_v46  ;;  %v227_v46 = vld [vmem:[#allocation5 + $0x348] sm:$0xff]  ;;  %v2888_v39 = vcombine.high %v148_v35, %v152_v36  ;;  %v208_v24 = vld [vmem:[#allocation5 + $0x2b0] sm:$0xff] }
  0xa2   :  { %v2966_v53 = vcombine.high %v227_v46, %v231_v47  ;;  %v2965_v59 = vcombine.low %v227_v46, %v231_v47  ;;  %v3290_v46 = vld [vmem:[#allocation8 + $0xc4] ss:$8 sps:$4 sm:$0xff]   ;;  %v2887_v47 = vcombine.low %v148_v35, %v152_v36 }
  0xa3   :  { %v220_v35 = vld [vmem:[#allocation5 + $0x310] sm:$0xff] }
  0xa4   :  { %1056 = vmatpush1.bf16.msra.mxu1 %v2901_v49  ;;  %v3266_v49 = vld [vmem:[#allocation8 + $0x44] ss:$8 sps:$4 sm:$0xff]  }
  0xa5   :  { %1057 = vmatprep.subr.bf16.mxu1 %v2910_v54  ;;  %2364 = vmatprep.subr.bf16.mxu0 %v3266_v49  ;;  %v235_v54 = vld [vmem:[#allocation5 + $0x388] sm:$0xff]  ;;  %v224_v36 = vld [vmem:[#allocation5 + $0x330] sm:$0xff] }
  0xa6   :  { %2365 = vmatpush1.bf16.msra.mxu0 %v3268_v52  ;;  %v168_v52 = vld [vmem:[#allocation5 + $0x170] sm:$0xff] }
  0xa7   :  { %995 = vmatmul.mubr.bf16.gmra.mrb[12].mxu1 %v3685_v55 }
  0xa8   :  { %1058 = vmatpush1.bf16.msra.mxu1 %v2909_v56  ;;  %1004 = vmatprep.mubr.bf16.mxu1 %v3687_v57  ;;  %v239_v56 = vld [vmem:[#allocation5 + $0x3a8] sm:$0xff] }
  0xa9   :  { %1059 = vmatprep.subr.bf16.mxu1 %v2918_v58  ;;  %v3269_v58 = vld [vmem:[#allocation8 + $0x54] ss:$8 sps:$4 sm:$0xff]   ;;  %v2974_v63 = vcombine.high %v235_v54, %v239_v56  ;;  %v2973_v4 = vcombine.low %v235_v54, %v239_v56 }
  0xaa   :  { %2366 = vmatprep.subr.bf16.mxu0 %v3269_v58  ;;  %v172_v58 = vld [vmem:[#allocation5 + $0x190] sm:$0xff] }
  0xab   :  { %2367 = vmatpush1.bf16.msra.mxu0 %v3271_v62  ;;  %v3295_v62 = vld [vmem:[#allocation8 + $0xd0] ss:$8 sps:$4 sm:$0xff]  }
  0xac   :  { %1060 = vmatpush1.bf16.msra.mxu1 %v2917_v61  ;;  %v104_v61 = vld [vmem:[#allocation2 + $0xf0] sm:$0xff]  ;;  %2368 = vmatprep.subr.bf16.mxu0 %v3272_v3 }
  0xad   :  { %1061 = vmatprep.subr.bf16.mxu1 %v2926_v0  ;;  %v243_v0 = vld [vmem:[#allocation5 + $0x3c8] sm:$0xff]  ;;  %v3709_v2 = vpack.c.bf16 %v104_v61, %v102_v60  ;;  %v3293_v60 = vld [vmem:[#allocation8 + $0xd4] ss:$8 sps:$4 sm:$0xff]  }
  0xae   :  { %v2981_v13 = vcombine.low %v243_v0, %v247_v1  ;;  %v3296_v3 = vld [vmem:[#allocation8 + $0xe4] ss:$8 sps:$4 sm:$0xff]  }
  0xaf   :  { %1005 = vmatmul.mubr.bf16.gmra.mrb[16].mxu1 %v3691_v5  ;;  %2369 = vmatpush1.bf16.msra.mxu0 %v3274_v6  ;;  %v3298_v6 = vld [vmem:[#allocation8 + $0xe0] ss:$8 sps:$4 sm:$0xff]  }
  0xb0   :  { %1062 = vmatpush1.bf16.msra.mxu1 %v2925_v7  ;;  %1014 = vmatprep.mubr.bf16.mxu1 %v3693_v8  ;;  %v2982_v7 = vcombine.high %v243_v0, %v247_v1  ;;  %v180_v0 = vld [vmem:[#allocation5 + $0x1d0] sm:$0xff] }
  0xb1   :  { %1063 = vmatprep.subr.bf16.mxu1 %v2934_v10  ;;  %v128_v10 = vld [vmem:[#allocation5 + $0x30] sm:$0xff]  ;;  %2370 = vmatprep.subr.bf16.mxu0 %v3275_v11  ;;  %v3299_v11 = vld [vmem:[#allocation8 + $0xf4] ss:$8 sps:$4 sm:$0xff]  }
  0xb2   :  { %v184_v1 = vld [vmem:[#allocation5 + $0x1f0] sm:$0xff] }
  0xb3   :  { %2371 = vmatpush1.bf16.msra.mxu0 %v3277_v15  ;;  %v3301_v15 = vld [vmem:[#allocation8 + $0xf0] ss:$8 sps:$4 sm:$0xff]  }
  0xb4   :  { %1064 = vmatpush1.bf16.msra.mxu1 %v2933_v16  ;;  %v2864_v16 = vcombine.high %v124_v9, %v128_v10  ;;  %2372 = vmatprep.subr.bf16.mxu0 %v3278_v19  ;;  %v3304_v19 = vld [vmem:[#allocation8 + $0x104] ss:$8 sps:$4 sm:$0xff]  }
  0xb5   :  { %1065 = vmatprep.subr.bf16.mxu1 %v2942_v21  ;;  %v2863_v21 = vcombine.low %v124_v9, %v128_v10  ;;  %v188_v9 = vld [vmem:[#allocation5 + $0x210] sm:$0xff] }
  0xb6   :  { %v192_v10 = vld [vmem:[#allocation5 + $0x230] sm:$0xff] }
  0xb7   :  { %1015 = vmatmul.mubr.bf16.gmra.mrb[20].mxu1 %v3697_v26  ;;  %2373 = vmatpush1.bf16.msra.mxu0 %v3280_v22 }
  0xb8   :  { %1066 = vmatpush1.bf16.msra.mxu1 %v2941_v30  ;;  %1024 = vmatprep.mubr.bf16.mxu1 %v3699_v31  ;;  %v3283_v30 = vld [vmem:[#allocation8 + $0x90] ss:$8 sps:$4 sm:$0xff]  }
  0xb9   :  { %1067 = vmatprep.subr.bf16.mxu1 %v2950_v33  ;;  %v2871_v33 = vcombine.low %v132_v17, %v136_v18  ;;  %2374 = vmatprep.subr.bf16.mxu0 %v3281_v28  ;;  %v196_v17 = vld [vmem:[#allocation5 + $0x250] sm:$0xff] }
  0xba   :  { %v200_v18 = vld [vmem:[#allocation5 + $0x270] sm:$0xff] }
  0xbb   :  { %2375 = vmatpush1.bf16.msra.mxu0 %v3283_v30  ;;  %v2936_v22 = vcombine.high %v196_v17, %v200_v18  ;;  %v2935_v25 = vcombine.low %v196_v17, %v200_v18  ;;  %v212_v30 = vld [vmem:[#allocation5 + $0x2d0] sm:$0xff]  ;;  %v165_v18 = vld [vmem:[#allocation5 + $0x158] sm:$0xff] }
  0xbc   :  { %1068 = vmatpush1.bf16.msra.mxu1 %v2949_v37  ;;  %v3286_v37 = vld [vmem:[#allocation8 + $0xa0] ss:$8 sps:$4 sm:$0xff]   ;;  %2376 = vmatprep.subr.bf16.mxu0 %v3284_v32 }
  0xbd   :  { %1069 = vmatprep.subr.bf16.mxu1 %v2958_v42  ;;  %v160_v42 = vld [vmem:[#allocation5 + $0x130] sm:$0xff] }
  0xbe   :  { %v2896_v49 = vcombine.high %v156_v40, %v160_v42  ;;  %v2895_v54 = vcombine.low %v156_v40, %v160_v42  ;;  %v216_v32 = vld [vmem:[#allocation5 + $0x2f0] sm:$0xff]  ;;  %v2959_v42 = vcombine.low %v220_v35, %v224_v36 }
  0xbf   :  { %1025 = vmatmul.mubr.bf16.gmra.mrb[24].mxu1 %v3703_v48  ;;  %2377 = vmatpush1.bf16.msra.mxu0 %v3286_v37  ;;  %v2951_v37 = vcombine.low %v212_v30, %v216_v32  ;;  %v232_v40 = vld [vmem:[#allocation5 + $0x370] sm:$0xff] }
  0xc0   :  { %1070 = vmatpush1.bf16.msra.mxu1 %v2957_v50  ;;  %1034 = vmatprep.mubr.bf16.mxu1 %v3705_v51  ;;  %v164_v50 = vld [vmem:[#allocation5 + $0x150] sm:$0xff] }
  0xc1   :  { %1071 = vmatprep.subr.bf16.mxu1 %v2966_v53  ;;  %2378 = vmatprep.subr.bf16.mxu0 %v3287_v44  ;;  %v3292_v53 = vld [vmem:[#allocation8 + $0xc0] ss:$8 sps:$4 sm:$0xff]   ;;  %v2904_v56 = vcombine.high %v164_v50, %v168_v52  ;;  %v2903_v61 = vcombine.low %v164_v50, %v168_v52 }
  0xc2   :  { %v244_v50 = vld [vmem:[#allocation5 + $0x3d0] sm:$0xff] }
  0xc3   :  { %2379 = vmatpush1.bf16.msra.mxu0 %v3289_v45  ;;  %v236_v45 = vld [vmem:[#allocation5 + $0x390] sm:$0xff] }
  0xc4   :  { %1072 = vmatpush1.bf16.msra.mxu1 %v2965_v59  ;;  %2380 = vmatprep.subr.bf16.mxu0 %v3290_v46  ;;  %v176_v59 = vld [vmem:[#allocation5 + $0x1b0] sm:$0xff] }
  0xc5   :  { %1073 = vmatprep.subr.bf16.mxu1 %v2974_v63  ;;  %v2912_v63 = vcombine.high %v172_v58, %v176_v59  ;;  %v240_v46 = vld [vmem:[#allocation5 + $0x3b0] sm:$0xff] }
  0xc6   :  { %v248_v52 = vld [vmem:[#allocation5 + $0x3f0] sm:$0xff] }
  0xc7   :  { %1035 = vmatmul.mubr.bf16.gmra.mrb[28].mxu1 %v3709_v2  ;;  %2381 = vmatpush1.bf16.msra.mxu0 %v3292_v53  ;;  %v2975_v53 = vcombine.low %v236_v45, %v240_v46 }
  0xc8   :  { %1074 = vmatpush1.bf16.msra.mxu1 %v2973_v4  ;;  %1077 = vmatprep.mubr.bf16.mxu1 %v3664_v20  ;;  %v2911_v4 = vcombine.low %v172_v58, %v176_v59  ;;  %v129_v58 = vld [vmem:[#allocation5 + $0x38] sm:$0xff]  ;;  %v2983_v59 = vcombine.low %v244_v50, %v248_v52 }
  0xc9   :  { %1075 = vmatprep.subr.bf16.mxu1 %v2982_v7  ;;  %2382 = vmatprep.subr.bf16.mxu0 %v3293_v60  ;;  %v2920_v7 = vcombine.high %v180_v0, %v184_v1 }
  0xcb   :  { %2383 = vmatpush1.bf16.msra.mxu0 %v3295_v62  ;;  %v137_v62 = vld [vmem:[#allocation5 + $0x78] sm:$0xff] }
  0xcc   :  { %1076 = vmatpush1.bf16.msra.mxu1 %v2981_v13  ;;  %2384 = vmatprep.subr.bf16.mxu0 %v3296_v3  ;;  %v2919_v13 = vcombine.low %v180_v0, %v184_v1  ;;  %v141_v1 = vld [vmem:[#allocation5 + $0x98] sm:$0xff] }
  0xcd   :  { %1158 = vmatprep.subr.bf16.mxu1 %v2864_v16  ;;  %v2928_v16 = vcombine.high %v188_v9, %v192_v10  ;;  %v145_v3 = vld [vmem:[#allocation5 + $0xb8] sm:$0xff] }
  0xcf   :  { %1078 = vmatmul.mubr.bf16.vlgmr.msra.gmra.mrb[32].mxu1 %v3667_v12  ;;  %2385 = vmatpush1.bf16.msra.mxu0 %v3298_v6  ;;  %v2882_v6 = vcombine.high %v141_v1, %v145_v3 }
  0xd0   :  { %1159 = vmatpush1.bf16.msra.mxu1 %v2863_v21  ;;  %1087 = vmatprep.mubr.bf16.mxu1 %v3669_v14  ;;  %v2927_v21 = vcombine.low %v188_v9, %v192_v10  ;;  %v153_v9 = vld [vmem:[#allocation5 + $0xf8] sm:$0xff]  ;;  %v2881_v10 = vcombine.low %v141_v1, %v145_v3 }
  0xd1   :  { %1160 = vmatprep.subr.bf16.mxu1 %v2872_v23  ;;  %2386 = vmatprep.subr.bf16.mxu0 %v3299_v11  ;;  %v204_v23 = vld [vmem:[#allocation5 + $0x290] sm:$0xff]  ;;  %v237_v1 = vld [vmem:[#allocation5 + $0x398] sm:$0xff] }
  0xd2   :  { %v2944_v28 = vcombine.high %v204_v23, %v208_v24  ;;  %v241_v3 = vld [vmem:[#allocation5 + $0x3b8] sm:$0xff] }
  0xd3   :  { %2387 = vmatpush1.bf16.msra.mxu0 %v3301_v15  ;;  %v161_v15 = vld [vmem:[#allocation5 + $0x138] sm:$0xff] }
  0xd4   :  { %1161 = vmatpush1.bf16.msra.mxu1 %v2871_v33  ;;  %2469 = vmatprep.subr.bf16.mxu0 %v3304_v19  ;;  %v2943_v33 = vcombine.low %v204_v23, %v208_v24  ;;  %v169_v19 = vld [vmem:[#allocation5 + $0x178] sm:$0xff] }
  0xd5   :  { %1162 = vmatprep.subr.bf16.mxu1 %v2880_v34  ;;  %v2952_v34 = vcombine.high %v212_v30, %v216_v32  ;;  %v173_v23 = vld [vmem:[#allocation5 + $0x198] sm:$0xff] }
  0xd6   :  { %v177_v24 = vld [vmem:[#allocation5 + $0x1b8] sm:$0xff] }
  0xd7   :  { %1088 = vmatmul.mubr.bf16.gmra.mrb[36].mxu1 %v3673_v27  ;;  %v181_v30 = vld [vmem:[#allocation5 + $0x1d8] sm:$0xff] }
  0xd8   :  { %1163 = vmatpush1.bf16.msra.mxu1 %v2879_v38  ;;  %1097 = vmatprep.mubr.bf16.mxu1 %v3675_v29  ;;  %v2960_v38 = vcombine.high %v220_v35, %v224_v36  ;;  %v185_v32 = vld [vmem:[#allocation5 + $0x1f8] sm:$0xff] }
  0xd9   :  { %1164 = vmatprep.subr.bf16.mxu1 %v2888_v39  ;;  %v228_v39 = vld [vmem:[#allocation5 + $0x350] sm:$0xff]  ;;  %v189_v35 = vld [vmem:[#allocation5 + $0x218] sm:$0xff] }
  0xda   :  { %v2968_v44 = vcombine.high %v228_v39, %v232_v40  ;;  %v193_v36 = vld [vmem:[#allocation5 + $0x238] sm:$0xff] }
  0xdc   :  { %1165 = vmatpush1.bf16.msra.mxu1 %v2887_v47  ;;  %v2967_v47 = vcombine.low %v228_v39, %v232_v40  ;;  %v197_v39 = vld [vmem:[#allocation5 + $0x258] sm:$0xff] }
  0xdd   :  { %1166 = vmatprep.subr.bf16.mxu1 %v2896_v49  ;;  %v2976_v49 = vcombine.high %v236_v45, %v240_v46  ;;  %v201_v40 = vld [vmem:[#allocation5 + $0x278] sm:$0xff] }
  0xde   :  { %v205_v45 = vld [vmem:[#allocation5 + $0x298] sm:$0xff] }
  0xdf   :  { %1098 = vmatmul.mubr.bf16.gmra.mrb[40].mxu1 %v3679_v41  ;;  %v209_v46 = vld [vmem:[#allocation5 + $0x2b8] sm:$0xff] }
  0xe0   :  { %1167 = vmatpush1.bf16.msra.mxu1 %v2895_v54  ;;  %1107 = vmatprep.mubr.bf16.mxu1 %v3681_v43  ;;  %v2984_v54 = vcombine.high %v244_v50, %v248_v52  ;;  %v213_v50 = vld [vmem:[#allocation5 + $0x2d8] sm:$0xff] }
  0xe1   :  { %1168 = vmatprep.subr.bf16.mxu1 %v2904_v56  ;;  %v125_v56 = vld [vmem:[#allocation5 + $0x18] sm:$0xff] }
  0xe2   :  { %v2866_v60 = vcombine.high %v125_v56, %v129_v58  ;;  %v217_v52 = vld [vmem:[#allocation5 + $0x2f8] sm:$0xff] }
  0xe4   :  { %1169 = vmatpush1.bf16.msra.mxu1 %v2903_v61  ;;  %v133_v61 = vld [vmem:[#allocation5 + $0x58] sm:$0xff] }
  0xe5   :  { %1170 = vmatprep.subr.bf16.mxu1 %v2912_v63  ;;  %v2865_v63 = vcombine.low %v125_v56, %v129_v58  ;;  %v2874_v0 = vcombine.high %v133_v61, %v137_v62  ;;  %v221_v56 = vld [vmem:[#allocation5 + $0x318] sm:$0xff] }
  0xe6   :  { %v225_v58 = vld [vmem:[#allocation5 + $0x338] sm:$0xff] }
  0xe7   :  { %1108 = vmatmul.mubr.bf16.gmra.mrb[44].mxu1 %v3685_v55 }
  0xe8   :  { %1171 = vmatpush1.bf16.msra.mxu1 %v2911_v4  ;;  %1117 = vmatprep.mubr.bf16.mxu1 %v3687_v57  ;;  %v2873_v4 = vcombine.low %v133_v61, %v137_v62  ;;  %v229_v61 = vld [vmem:[#allocation5 + $0x358] sm:$0xff] }
  0xe9   :  { %1172 = vmatprep.subr.bf16.mxu1 %v2920_v7  ;;  %v149_v7 = vld [vmem:[#allocation5 + $0xd8] sm:$0xff] }
  0xea   :  { %v2890_v11 = vcombine.high %v149_v7, %v153_v9  ;;  %v233_v62 = vld [vmem:[#allocation5 + $0x378] sm:$0xff] }
  0xec   :  { %1173 = vmatpush1.bf16.msra.mxu1 %v2919_v13  ;;  %v157_v13 = vld [vmem:[#allocation5 + $0x118] sm:$0xff] }
  0xed   :  { %1174 = vmatprep.subr.bf16.mxu1 %v2928_v16  ;;  %v2889_v16 = vcombine.low %v149_v7, %v153_v9  ;;  %v2898_v17 = vcombine.high %v157_v13, %v161_v15  ;;  %v245_v7 = vld [vmem:[#allocation5 + $0x3d8] sm:$0xff] }
  0xee   :  { %v249_v9 = vld [vmem:[#allocation5 + $0x3f8] sm:$0xff] }
  0xef   :  { %1118 = vmatmul.mubr.bf16.gmra.mrb[48].mxu1 %v3691_v5 }
  0xf0   :  { %1175 = vmatpush1.bf16.msra.mxu1 %v2927_v21  ;;  %1127 = vmatprep.mubr.bf16.mxu1 %v3693_v8  ;;  %v2897_v21 = vcombine.low %v157_v13, %v161_v15  ;;  %v2985_v13 = vcombine.low %v245_v7, %v249_v9  ;;  %v252_v15 = vlaneseq }
  0xf1   :  { %1176 = vmatprep.subr.bf16.mxu1 %v2936_v22  ;;  %v2906_v22 = vcombine.high %v165_v18, %v169_v19 }
  0xf4   :  { %1177 = vmatpush1.bf16.msra.mxu1 %v2935_v25  ;;  %v2905_v25 = vcombine.low %v165_v18, %v169_v19  ;;  %v3752_v18 = vld [vmem:[#allocation7] sm:$0xff] }
  0xf5   :  { %1178 = vmatprep.subr.bf16.mxu1 %v2944_v28  ;;  %v2914_v28 = vcombine.high %v173_v23, %v177_v24 }
  0xf7   :  { %1128 = vmatmul.mubr.bf16.gmra.mrb[52].mxu1 %v3697_v26 }
  0xf8   :  { %1179 = vmatpush1.bf16.msra.mxu1 %v2943_v33  ;;  %1137 = vmatprep.mubr.bf16.mxu1 %v3699_v31  ;;  %v2913_v33 = vcombine.low %v173_v23, %v177_v24 }
  0xf9   :  { %1180 = vmatprep.subr.bf16.mxu1 %v2952_v34  ;;  %v2922_v34 = vcombine.high %v181_v30, %v185_v32 }
  0xfc   :  { %1181 = vmatpush1.bf16.msra.mxu1 %v2951_v37  ;;  %v2921_v37 = vcombine.low %v181_v30, %v185_v32 }
  0xfd   :  { %1182 = vmatprep.subr.bf16.mxu1 %v2960_v38  ;;  %v2930_v38 = vcombine.high %v189_v35, %v193_v36 }
  0xff   :  { %1138 = vmatmul.mubr.bf16.gmra.mrb[56].mxu1 %v3703_v48 }
 0x100   :  { %1183 = vmatpush1.bf16.msra.mxu1 %v2959_v42  ;;  %1147 = vmatprep.mubr.bf16.mxu1 %v3705_v51  ;;  %v2929_v42 = vcombine.low %v189_v35, %v193_v36  ;;  %v3302_v35 = vld [vmem:[#allocation8 + $0x100] ss:$8 sps:$4 sm:$0xff]  }
 0x101   :  { %1184 = vmatprep.subr.bf16.mxu1 %v2968_v44  ;;  %v2938_v44 = vcombine.high %v197_v39, %v201_v40 }
 0x104   :  { %1185 = vmatpush1.bf16.msra.mxu1 %v2967_v47  ;;  %v2937_v47 = vcombine.low %v197_v39, %v201_v40 }
 0x105   :  { %1186 = vmatprep.subr.bf16.mxu1 %v2976_v49  ;;  %v2946_v49 = vcombine.high %v205_v45, %v209_v46 }
 0x107   :  { %1148 = vmatmul.mubr.bf16.gmra.mrb[60].mxu1 %v3709_v2 }
 0x108   :  { %1187 = vmatpush1.bf16.msra.mxu1 %v2975_v53  ;;  %1190 = vmatprep.mubr.bf16.mxu1 %v3664_v20  ;;  %v2945_v53 = vcombine.low %v205_v45, %v209_v46 }
 0x109   :  { %1188 = vmatprep.subr.bf16.mxu1 %v2984_v54  ;;  %v2954_v54 = vcombine.high %v213_v50, %v217_v52 }
 0x10c   :  { %1189 = vmatpush1.bf16.msra.mxu1 %v2983_v59  ;;  %v2953_v59 = vcombine.low %v213_v50, %v217_v52 }
 0x10d   :  { %1271 = vmatprep.subr.bf16.mxu1 %v2866_v60  ;;  %v2962_v60 = vcombine.high %v221_v56, %v225_v58 }
 0x10f   :  { %1191 = vmatmul.mubr.bf16.vlgmr.msra.gmra.mrb[64].mxu1 %v3667_v12 }
 0x110   :  { %1272 = vmatpush1.bf16.msra.mxu1 %v2865_v63  ;;  %1200 = vmatprep.mubr.bf16.mxu1 %v3669_v14  ;;  %v2961_v63 = vcombine.low %v221_v56, %v225_v58  ;;  %v3308_v56 = vld [vmem:[#allocation8 + $0x120] ss:$8 sps:$4 sm:$0xff]  }
 0x111   :  { %1273 = vmatprep.subr.bf16.mxu1 %v2874_v0  ;;  %v2970_v0 = vcombine.high %v229_v61, %v233_v62 }
 0x114   :  { %1274 = vmatpush1.bf16.msra.mxu1 %v2873_v4  ;;  %v2969_v4 = vcombine.low %v229_v61, %v233_v62 }
 0x115   :  { %1275 = vmatprep.subr.bf16.mxu1 %v2882_v6  ;;  %v2978_v6 = vcombine.high %v237_v1, %v241_v3 }
 0x117   :  { %1201 = vmatmul.mubr.bf16.gmra.mrb[68].mxu1 %v3673_v27 }
 0x118   :  { %1276 = vmatpush1.bf16.msra.mxu1 %v2881_v10  ;;  %1210 = vmatprep.mubr.bf16.mxu1 %v3675_v29  ;;  %v2977_v10 = vcombine.low %v237_v1, %v241_v3 }
 0x119   :  { %1277 = vmatprep.subr.bf16.mxu1 %v2890_v11  ;;  %v2986_v11 = vcombine.high %v245_v7, %v249_v9 }
 0x11c   :  { %1278 = vmatpush1.bf16.msra.mxu1 %v2889_v16  ;;  %v3748_v16 = vshrl.u32 %v252_v15, 7 }
 0x11d   :  { %1279 = vmatprep.subr.bf16.mxu1 %v2898_v17 }
 0x11e   :  { %v254_v17 = vsub.s32 0, %v3748_v16  ;;  %v258_v19 = vsub.s32 1, %v3748_v16 }
 0x11f   :  { %1211 = vmatmul.mubr.bf16.gmra.mrb[72].mxu1 %v3679_v41 }
 0x120   :  { %1280 = vmatpush1.bf16.msra.mxu1 %v2897_v21  ;;  %1220 = vmatprep.mubr.bf16.mxu1 %v3681_v43 }
 0x121   :  { %1281 = vmatprep.subr.bf16.mxu1 %v2906_v22 }
 0x124   :  { %1282 = vmatpush1.bf16.msra.mxu1 %v2905_v25 }
 0x125   :  { %1283 = vmatprep.subr.bf16.mxu1 %v2914_v28 }
 0x127   :  { %1221 = vmatmul.mubr.bf16.gmra.mrb[76].mxu1 %v3685_v55 }
 0x128   :  { %1284 = vmatpush1.bf16.msra.mxu1 %v2913_v33  ;;  %1230 = vmatprep.mubr.bf16.mxu1 %v3687_v57 }
 0x129   :  { %1285 = vmatprep.subr.bf16.mxu1 %v2922_v34 }
 0x12c   :  { %1286 = vmatpush1.bf16.msra.mxu1 %v2921_v37 }
 0x12d   :  { %1287 = vmatprep.subr.bf16.mxu1 %v2930_v38  ;;  %v3307_v38 = vld [vmem:[#allocation8 + $0x114] ss:$8 sps:$4 sm:$0xff]  }
 0x12f   :  { %1231 = vmatmul.mubr.bf16.gmra.mrb[80].mxu1 %v3691_v5 }
 0x130   :  { %1288 = vmatpush1.bf16.msra.mxu1 %v2929_v42  ;;  %1240 = vmatprep.mubr.bf16.mxu1 %v3693_v8 }
 0x131   :  { %1289 = vmatprep.subr.bf16.mxu1 %v2938_v44 }
 0x134   :  { %1290 = vmatpush1.bf16.msra.mxu1 %v2937_v47  ;;  %v3310_v47 = vld [vmem:[#allocation8 + $0x124] ss:$8 sps:$4 sm:$0xff]  }
 0x135   :  { %1291 = vmatprep.subr.bf16.mxu1 %v2946_v49 }
 0x137   :  { %1241 = vmatmul.mubr.bf16.gmra.mrb[84].mxu1 %v3697_v26 }
 0x138   :  { %1292 = vmatpush1.bf16.msra.mxu1 %v2945_v53  ;;  %1250 = vmatprep.mubr.bf16.mxu1 %v3699_v31 }
 0x139   :  { %1293 = vmatprep.subr.bf16.mxu1 %v2954_v54 }
 0x13c   :  { %1294 = vmatpush1.bf16.msra.mxu1 %v2953_v59 }
 0x13d   :  { %1295 = vmatprep.subr.bf16.mxu1 %v2962_v60  ;;  %v3313_v60 = vld [vmem:[#allocation8 + $0x134] ss:$8 sps:$4 sm:$0xff]  }
 0x13f   :  { %1251 = vmatmul.mubr.bf16.gmra.mrb[88].mxu1 %v3703_v48 }
 0x140   :  { %1296 = vmatpush1.bf16.msra.mxu1 %v2961_v63  ;;  %1260 = vmatprep.mubr.bf16.mxu1 %v3705_v51 }
 0x141   :  { %1297 = vmatprep.subr.bf16.mxu1 %v2970_v0  ;;  %v3311_v0 = vld [vmem:[#allocation8 + $0x130] ss:$8 sps:$4 sm:$0xff]  }
 0x144   :  { %1298 = vmatpush1.bf16.msra.mxu1 %v2969_v4  ;;  %v3316_v4 = vld [vmem:[#allocation8 + $0x144] ss:$8 sps:$4 sm:$0xff]  }
 0x145   :  { %1299 = vmatprep.subr.bf16.mxu1 %v2978_v6 }
 0x147   :  { %1261 = vmatmul.mubr.bf16.gmra.mrb[92].mxu1 %v3709_v2 }
 0x148   :  { %1300 = vmatpush1.bf16.msra.mxu1 %v2977_v10  ;;  %1303 = vmatprep.mubr.bf16.mxu1 %v3664_v20  ;;  %v3759_v20 = vrot.slane %v3752_v18, %v254_v17 }
 0x149   :  { %1301 = vmatprep.subr.bf16.mxu1 %v2986_v11 }
 0x14c   :  { %1302 = vmatpush1.bf16.msra.mxu1 %v2985_v13  ;;  %v3314_v13 = vld [vmem:[#allocation8 + $0x140] ss:$8 sps:$4 sm:$0xff]  }
 0x14f   :  { %1304 = vmatmul.mubr.bf16.vlgmr.msra.gmra.mrb[96].mxu1 %v3667_v12  ;;  %v3764_v12 = vrot.slane %v3752_v18, %v258_v19 }
 0x150   :  { %1313 = vmatprep.mubr.bf16.mxu1 %v3669_v14 }
 0x157   :  { %1314 = vmatmul.mubr.bf16.gmra.mrb[100].mxu1 %v3673_v27 }
 0x158   :  { %1323 = vmatprep.mubr.bf16.mxu1 %v3675_v29 }
 0x15f   :  { %1324 = vmatmul.mubr.bf16.gmra.mrb[104].mxu1 %v3679_v41 }
 0x160   :  { %1333 = vmatprep.mubr.bf16.mxu1 %v3681_v43 }
 0x162   :  { %v966_v14 = vpop.f32.mrb[0].mxu1 }
 0x163   :  { %v967_v27 = vadd.f32 %v966_v14, %v3759_v20  ;;  %v968_v29 = vpop.f32.mrb[1].mxu1 }
 0x164   :  { %v969_v21 = vadd.f32 %v968_v29, %v3764_v12  ;;  %v970_v22 = vpop.f32.mrb[2].mxu1 }
 0x165   :  { %v971_v41 = vadd.f32 %v970_v22, %v3759_v20  ;;  %v972_v23 = vpop.f32.mrb[3].mxu1  ;;  %v1384_v25 = vmax.f32 %v967_v27, 0.0  ;;  %v3319_v27 = vld [vmem:[#allocation8 + $0x154] ss:$8 sps:$4 sm:$0xff]  }
 0x166   :  { %v973_v24 = vadd.f32 %v972_v23, %v3764_v12  ;;  %v1385_v30 = vmax.f32 %v969_v21, 0.0 }
 0x167   :  { %v1392_v28 = vmax.f32 %v971_v41, 0.0  ;;  %1334 = vmatmul.mubr.bf16.gmra.mrb[108].mxu1 %v3685_v55  ;;  %v3317_v41 = vld [vmem:[#allocation8 + $0x150] ss:$8 sps:$4 sm:$0xff]  }
 0x168   :  { %v1393_v32 = vmax.f32 %v973_v24, 0.0  ;;  %1343 = vmatprep.mubr.bf16.mxu1 %v3687_v57  ;;  %v3305_v57 = vld [vmem:[#allocation8 + $0x110] ss:$8 sps:$4 sm:$0xff]  }
 0x169   :  { %v1512_v43 = vpack.c.bf16 %v1392_v28, %v1384_v25  ;;  %v3322_v25 = vld [vmem:[#allocation8 + $0x164] ss:$8 sps:$4 sm:$0xff]  }
 0x16a   :  { %v976_v33 = vpop.f32.mrb[4].mxu1  ;;  %v1513_v34 = vpack.c.bf16 %v1393_v32, %v1385_v30 }
 0x16b   :  { %v977_v36 = vadd.f32 %v976_v33, %v3759_v20  ;;  %v978_v37 = vpop.f32.mrb[5].mxu1 }
 0x16c   :  { %v979_v39 = vadd.f32 %v978_v37, %v3764_v12  ;;  %v980_v40 = vpop.f32.mrb[6].mxu1  ;;  %2388 = vmatprep.mubr.bf16.mxu0 %v1513_v34  ;;  %v3320_v34 = vld [vmem:[#allocation8 + $0x160] ss:$8 sps:$4 sm:$0xff]   ;;  %v3325_v37 = vld [vmem:[#allocation8 + $0x174] ss:$8 sps:$4 sm:$0xff]  }
 0x16d   :  { %v981_v42 = vadd.f32 %v980_v40, %v3759_v20  ;;  %v982_v44 = vpop.f32.mrb[7].mxu1  ;;  %2389 = vmatmul.mubr.bf16.vlgmr.msra.gmra.mrb[0].mxu0 %v1512_v43  ;;  %v1400_v45 = vmax.f32 %v977_v36, 0.0 }
 0x16e   :  { %v983_v55 = vadd.f32 %v982_v44, %v3764_v12  ;;  %2470 = vmatpush1.bf16.msra.mxu0 %v3302_v35  ;;  %v1401_v49 = vmax.f32 %v979_v39, 0.0 }
 0x16f   :  { %v1408_v46 = vmax.f32 %v981_v42, 0.0  ;;  %1344 = vmatmul.mubr.bf16.gmra.mrb[112].mxu1 %v3691_v5  ;;  %2471 = vmatprep.subr.bf16.mxu0 %v3307_v38  ;;  %v3323_v42 = vld [vmem:[#allocation8 + $0x170] ss:$8 sps:$4 sm:$0xff]  }
 0x170   :  { %v1409_v50 = vmax.f32 %v983_v55, 0.0  ;;  %1353 = vmatprep.mubr.bf16.mxu1 %v3693_v8 }
 0x171   :  { %v1520_v52 = vpack.c.bf16 %v1408_v46, %v1400_v45 }
 0x172   :  { %v1521_v53 = vpack.c.bf16 %v1409_v50, %v1401_v49  ;;  %v986_v54 = vpop.f32.mrb[8].mxu1  ;;  %2472 = vmatpush1.bf16.msra.mxu0 %v3305_v57  ;;  %v3328_v57 = vld [vmem:[#allocation8 + $0x184] ss:$8 sps:$4 sm:$0xff]  }
 0x173   :  { %v987_v58 = vadd.f32 %v986_v54, %v3759_v20  ;;  %v988_v59 = vpop.f32.mrb[9].mxu1  ;;  %2473 = vmatprep.subr.bf16.mxu0 %v3310_v47 }
 0x174   :  { %v989_v61 = vadd.f32 %v988_v59, %v3764_v12  ;;  %v990_v62 = vpop.f32.mrb[10].mxu1  ;;  %2398 = vmatprep.mubr.bf16.mxu0 %v1521_v53 }
 0x175   :  { %v991_v5 = vadd.f32 %v990_v62, %v3759_v20  ;;  %v992_v63 = vpop.f32.mrb[11].mxu1  ;;  %2399 = vmatmul.mubr.bf16.gmra.mrb[4].mxu0 %v1520_v52  ;;  %v1416_v1 = vmax.f32 %v987_v58, 0.0  ;;  %v3326_v52 = vld [vmem:[#allocation8 + $0x180] ss:$8 sps:$4 sm:$0xff]   ;;  %v3329_v62 = vld [vmem:[#allocation8 + $0x190] ss:$8 sps:$4 sm:$0xff]  }
 0x176   :  { %v993_v8 = vadd.f32 %v992_v63, %v3764_v12  ;;  %2474 = vmatpush1.bf16.msra.mxu0 %v3308_v56  ;;  %v1417_v6 = vmax.f32 %v989_v61, 0.0  ;;  %v3331_v56 = vld [vmem:[#allocation8 + $0x194] ss:$8 sps:$4 sm:$0xff]  }
 0x177   :  { %v1424_v3 = vmax.f32 %v991_v5, 0.0  ;;  %1354 = vmatmul.mubr.bf16.gmra.mrb[116].mxu1 %v3697_v26  ;;  %2475 = vmatprep.subr.bf16.mxu0 %v3313_v60 }
 0x178   :  { %v1425_v7 = vmax.f32 %v993_v8, 0.0  ;;  %1363 = vmatprep.mubr.bf16.mxu1 %v3699_v31  ;;  %v3334_v8 = vld [vmem:[#allocation8 + $0x1a4] ss:$8 sps:$4 sm:$0xff]  }
 0x179   :  { %v1528_v9 = vpack.c.bf16 %v1424_v3, %v1416_v1 }
 0x17a   :  { %v1529_v10 = vpack.c.bf16 %v1425_v7, %v1417_v6  ;;  %v996_v11 = vpop.f32.mrb[12].mxu1  ;;  %2476 = vmatpush1.bf16.msra.mxu0 %v3311_v0  ;;  %v3332_v7 = vld [vmem:[#allocation8 + $0x1a0] ss:$8 sps:$4 sm:$0xff]  }
 0x17b   :  { %v997_v15 = vadd.f32 %v996_v11, %v3759_v20  ;;  %v998_v14 = vpop.f32.mrb[13].mxu1  ;;  %2477 = vmatprep.subr.bf16.mxu0 %v3316_v4  ;;  %v3337_v11 = vld [vmem:[#allocation8 + $0x1b4] ss:$8 sps:$4 sm:$0xff]  }
 0x17c   :  { %v999_v29 = vadd.f32 %v998_v14, %v3764_v12  ;;  %v1000_v21 = vpop.f32.mrb[14].mxu1  ;;  %2408 = vmatprep.mubr.bf16.mxu0 %v1529_v10 }
 0x17d   :  { %v1001_v26 = vadd.f32 %v1000_v21, %v3759_v20  ;;  %v1002_v22 = vpop.f32.mrb[15].mxu1  ;;  %2409 = vmatmul.mubr.bf16.gmra.mrb[8].mxu0 %v1528_v9  ;;  %v1432_v23 = vmax.f32 %v997_v15, 0.0  ;;  %v3335_v21 = vld [vmem:[#allocation8 + $0x1b0] ss:$8 sps:$4 sm:$0xff]  }
 0x17e   :  { %v1003_v31 = vadd.f32 %v1002_v22, %v3764_v12  ;;  %2478 = vmatpush1.bf16.msra.mxu0 %v3314_v13  ;;  %v1433_v28 = vmax.f32 %v999_v29, 0.0 }
 0x17f   :  { %v1440_v24 = vmax.f32 %v1001_v26, 0.0  ;;  %1364 = vmatmul.mubr.bf16.gmra.mrb[120].mxu1 %v3703_v48  ;;  %2479 = vmatprep.subr.bf16.mxu0 %v3319_v27 }
 0x180   :  { %v1441_v30 = vmax.f32 %v1003_v31, 0.0  ;;  %1373 = vmatprep.mubr.bf16.mxu1 %v3705_v51  ;;  %v3340_v31 = vld [vmem:[#allocation8 + $0x1c4] ss:$8 sps:$4 sm:$0xff]  }
 0x181   :  { %v1536_v32 = vpack.c.bf16 %v1440_v24, %v1432_v23 }
 0x182   :  { %v1537_v43 = vpack.c.bf16 %v1441_v30, %v1433_v28  ;;  %v1006_v33 = vpop.f32.mrb[16].mxu1  ;;  %2480 = vmatpush1.bf16.msra.mxu0 %v3317_v41  ;;  %v3338_v30 = vld [vmem:[#allocation8 + $0x1c0] ss:$8 sps:$4 sm:$0xff]  }
 0x183   :  { %v1007_v35 = vadd.f32 %v1006_v33, %v3759_v20  ;;  %v1008_v36 = vpop.f32.mrb[17].mxu1  ;;  %2481 = vmatprep.subr.bf16.mxu0 %v3322_v25  ;;  %v3343_v33 = vld [vmem:[#allocation8 + $0x1d4] ss:$8 sps:$4 sm:$0xff]  }
 0x184   :  { %v1009_v38 = vadd.f32 %v1008_v36, %v3764_v12  ;;  %v1010_v39 = vpop.f32.mrb[18].mxu1  ;;  %2418 = vmatprep.mubr.bf16.mxu0 %v1537_v43 }
 0x185   :  { %v1011_v48 = vadd.f32 %v1010_v39, %v3759_v20  ;;  %v1012_v40 = vpop.f32.mrb[19].mxu1  ;;  %2419 = vmatmul.mubr.bf16.gmra.mrb[12].mxu0 %v1536_v32  ;;  %v1448_v44 = vmax.f32 %v1007_v35, 0.0 }
 0x186   :  { %v1013_v51 = vadd.f32 %v1012_v40, %v3764_v12  ;;  %2482 = vmatpush1.bf16.msra.mxu0 %v3320_v34  ;;  %v1449_v45 = vmax.f32 %v1009_v38, 0.0  ;;  %v262_v34 = vsub.s32 2, %v3748_v16  ;;  %v3341_v40 = vld [vmem:[#allocation8 + $0x1d0] ss:$8 sps:$4 sm:$0xff]  }
 0x187   :  { %v1456_v55 = vmax.f32 %v1011_v48, 0.0  ;;  %1374 = vmatmul.mubr.bf16.gmra.mrb[124].mxu1 %v3709_v2  ;;  %2483 = vmatprep.subr.bf16.mxu0 %v3325_v37  ;;  %v266_v37 = vsub.s32 3, %v3748_v16 }
 0x188   :  { %v1457_v46 = vmax.f32 %v1013_v51, 0.0 }
 0x189   :  { %v1544_v47 = vpack.c.bf16 %v1456_v55, %v1448_v44  ;;  %v3811_v44 = vrot.slane %v3752_v18, %v262_v34  ;;  %v3346_v55 = vld [vmem:[#allocation8 + $0x1e4] ss:$8 sps:$4 sm:$0xff]  }
 0x18a   :  { %v1545_v49 = vpack.c.bf16 %v1457_v46, %v1449_v45  ;;  %v1016_v50 = vpop.f32.mrb[20].mxu1  ;;  %2484 = vmatpush1.bf16.msra.mxu0 %v3323_v42  ;;  %v3814_v46 = vrot.slane %v3752_v18, %v266_v37  ;;  %v3359_v37 = vld [vmem:[#allocation8 + $0x230] ss:$8 sps:$4 sm:$0xff]  }
 0x18b   :  { %v1017_v53 = vadd.f32 %v1016_v50, %v3759_v20  ;;  %v1018_v54 = vpop.f32.mrb[21].mxu1  ;;  %2485 = vmatprep.subr.bf16.mxu0 %v3328_v57  ;;  %v3344_v50 = vld [vmem:[#allocation8 + $0x1e0] ss:$8 sps:$4 sm:$0xff]  }
 0x18c   :  { %v1019_v58 = vadd.f32 %v1018_v54, %v3764_v12  ;;  %v1020_v59 = vpop.f32.mrb[22].mxu1  ;;  %2428 = vmatprep.mubr.bf16.mxu0 %v1545_v49 }
 0x18d   :  { %v1021_v2 = vadd.f32 %v1020_v59, %v3759_v20  ;;  %v1022_v60 = vpop.f32.mrb[23].mxu1  ;;  %2429 = vmatmul.mubr.bf16.gmra.mrb[16].mxu0 %v1544_v47  ;;  %v1464_v5 = vmax.f32 %v1017_v53, 0.0  ;;  %v3349_v53 = vld [vmem:[#allocation8 + $0x1f4] ss:$8 sps:$4 sm:$0xff]  }
 0x18e   :  { %v1023_v61 = vadd.f32 %v1022_v60, %v3764_v12  ;;  %2486 = vmatpush1.bf16.msra.mxu0 %v3326_v52  ;;  %v1465_v0 = vmax.f32 %v1019_v58, 0.0  ;;  %v3347_v60 = vld [vmem:[#allocation8 + $0x1f0] ss:$8 sps:$4 sm:$0xff]  }
 0x18f   :  { %v1472_v63 = vmax.f32 %v1021_v2, 0.0  ;;  %2487 = vmatprep.subr.bf16.mxu0 %v3331_v56 }
 0x190   :  { %v1473_v1 = vmax.f32 %v1023_v61, 0.0 }
 0x191   :  { %v1552_v3 = vpack.c.bf16 %v1472_v63, %v1464_v5  ;;  %v3352_v5 = vld [vmem:[#allocation8 + $0x204] ss:$8 sps:$4 sm:$0xff]  }
 0x192   :  { %v1553_v4 = vpack.c.bf16 %v1473_v1, %v1465_v0  ;;  %v1026_v6 = vpop.f32.mrb[24].mxu1  ;;  %2488 = vmatpush1.bf16.msra.mxu0 %v3329_v62 }
 0x193   :  { %v1027_v9 = vadd.f32 %v1026_v6, %v3759_v20  ;;  %v1028_v10 = vpop.f32.mrb[25].mxu1  ;;  %2489 = vmatprep.subr.bf16.mxu0 %v3334_v8 }
 0x194   :  { %v1029_v13 = vadd.f32 %v1028_v10, %v3764_v12  ;;  %v1030_v15 = vpop.f32.mrb[26].mxu1  ;;  %2438 = vmatprep.mubr.bf16.mxu0 %v1553_v4  ;;  %v3350_v4 = vld [vmem:[#allocation8 + $0x200] ss:$8 sps:$4 sm:$0xff]  }
 0x195   :  { %v1031_v14 = vadd.f32 %v1030_v15, %v3759_v20  ;;  %v1032_v27 = vpop.f32.mrb[27].mxu1  ;;  %2439 = vmatmul.mubr.bf16.gmra.mrb[20].mxu0 %v1552_v3  ;;  %v1480_v26 = vmax.f32 %v1027_v9, 0.0  ;;  %v3355_v9 = vld [vmem:[#allocation8 + $0x214] ss:$8 sps:$4 sm:$0xff]  }
 0x196   :  { %v1033_v29 = vadd.f32 %v1032_v27, %v3764_v12  ;;  %2490 = vmatpush1.bf16.msra.mxu0 %v3332_v7  ;;  %v1481_v41 = vmax.f32 %v1029_v13, 0.0  ;;  %v3353_v27 = vld [vmem:[#allocation8 + $0x210] ss:$8 sps:$4 sm:$0xff]  }
 0x197   :  { %v1488_v22 = vmax.f32 %v1031_v14, 0.0  ;;  %2491 = vmatprep.subr.bf16.mxu0 %v3337_v11 }
 0x198   :  { %v1489_v23 = vmax.f32 %v1033_v29, 0.0 }
 0x199   :  { %v1560_v24 = vpack.c.bf16 %v1488_v22, %v1480_v26  ;;  %v3358_v26 = vld [vmem:[#allocation8 + $0x224] ss:$8 sps:$4 sm:$0xff]  }
 0x19a   :  { %v1561_v25 = vpack.c.bf16 %v1489_v23, %v1481_v41  ;;  %v1036_v28 = vpop.f32.mrb[28].mxu1  ;;  %2492 = vmatpush1.bf16.msra.mxu0 %v3335_v21 }
 0x19b   :  { %v1037_v32 = vadd.f32 %v1036_v28, %v3759_v20  ;;  %v1038_v43 = vpop.f32.mrb[29].mxu1  ;;  %2493 = vmatprep.subr.bf16.mxu0 %v3340_v31 }
 0x19c   :  { %v1039_v35 = vadd.f32 %v1038_v43, %v3764_v12  ;;  %v1040_v36 = vpop.f32.mrb[30].mxu1  ;;  %2448 = vmatprep.mubr.bf16.mxu0 %v1561_v25  ;;  %v3356_v25 = vld [vmem:[#allocation8 + $0x220] ss:$8 sps:$4 sm:$0xff]  }
 0x19d   :  { %v1041_v38 = vadd.f32 %v1040_v36, %v3759_v20  ;;  %v1042_v39 = vpop.f32.mrb[31].mxu1  ;;  %2449 = vmatmul.mubr.bf16.gmra.mrb[24].mxu0 %v1560_v24  ;;  %v1496_v51 = vmax.f32 %v1037_v32, 0.0  ;;  %v3361_v32 = vld [vmem:[#allocation8 + $0x234] ss:$8 sps:$4 sm:$0xff]  }
 0x19e   :  { %v1043_v48 = vadd.f32 %v1042_v39, %v3764_v12  ;;  %2494 = vmatpush1.bf16.msra.mxu0 %v3338_v30  ;;  %v1497_v57 = vmax.f32 %v1039_v35, 0.0 }
 0x19f   :  { %v1504_v42 = vmax.f32 %v1041_v38, 0.0  ;;  %2495 = vmatprep.subr.bf16.mxu0 %v3343_v33 }
 0x1a0   :  { %v1505_v45 = vmax.f32 %v1043_v48, 0.0  ;;  %v3364_v48 = vld [vmem:[#allocation8 + $0x244] ss:$8 sps:$4 sm:$0xff]  }
 0x1a1   :  { %v1568_v47 = vpack.c.bf16 %v1504_v42, %v1496_v51 }
 0x1a2   :  { %v1569_v20 = vpack.c.bf16 %v1505_v45, %v1497_v57  ;;  %v1079_v49 = vpop.f32.mrb[32].mxu1  ;;  %2496 = vmatpush1.bf16.msra.mxu0 %v3341_v40  ;;  %v3362_v45 = vld [vmem:[#allocation8 + $0x240] ss:$8 sps:$4 sm:$0xff]  }
 0x1a3   :  { %v1080_v12 = vadd.f32 %v1079_v49, %v3811_v44  ;;  %v1081_v52 = vpop.f32.mrb[33].mxu1  ;;  %2497 = vmatprep.subr.bf16.mxu0 %v3346_v55  ;;  %v3367_v49 = vld [vmem:[#allocation8 + $0x254] ss:$8 sps:$4 sm:$0xff]  }
 0x1a4   :  { %v1082_v54 = vadd.f32 %v1081_v52, %v3814_v46  ;;  %v1083_v56 = vpop.f32.mrb[34].mxu1  ;;  %2458 = vmatprep.mubr.bf16.mxu0 %v1569_v20 }
 0x1a5   :  { %v1084_v58 = vadd.f32 %v1083_v56, %v3811_v44  ;;  %v1085_v59 = vpop.f32.mrb[35].mxu1  ;;  %2459 = vmatmul.mubr.bf16.gmra.mrb[28].mxu0 %v1568_v47  ;;  %v1386_v61 = vmax.f32 %v1080_v12, 0.0  ;;  %v3365_v56 = vld [vmem:[#allocation8 + $0x250] ss:$8 sps:$4 sm:$0xff]  }
 0x1a6   :  { %v1086_v2 = vadd.f32 %v1085_v59, %v3814_v46  ;;  %2498 = vmatpush1.bf16.msra.mxu0 %v3344_v50  ;;  %v1387_v63 = vmax.f32 %v1082_v54, 0.0 }
 0x1a7   :  { %v1394_v62 = vmax.f32 %v1084_v58, 0.0  ;;  %2499 = vmatprep.subr.bf16.mxu0 %v3349_v53 }
 0x1a8   :  { %v1395_v8 = vmax.f32 %v1086_v2, 0.0  ;;  %v3370_v2 = vld [vmem:[#allocation8 + $0x264] ss:$8 sps:$4 sm:$0xff]  }
 0x1a9   :  { %v1514_v0 = vpack.c.bf16 %v1394_v62, %v1386_v61 }
 0x1aa   :  { %v1515_v1 = vpack.c.bf16 %v1395_v8, %v1387_v63  ;;  %v1089_v3 = vpop.f32.mrb[36].mxu1  ;;  %2500 = vmatpush1.bf16.msra.mxu0 %v3347_v60  ;;  %v3368_v8 = vld [vmem:[#allocation8 + $0x260] ss:$8 sps:$4 sm:$0xff]  }
 0x1ab   :  { %v1090_v6 = vadd.f32 %v1089_v3, %v3811_v44  ;;  %v1091_v7 = vpop.f32.mrb[37].mxu1  ;;  %2582 = vmatprep.subr.bf16.mxu0 %v3352_v5  ;;  %v3373_v3 = vld [vmem:[#allocation8 + $0x274] ss:$8 sps:$4 sm:$0xff]  }
 0x1ac   :  { %v1092_v10 = vadd.f32 %v1091_v7, %v3814_v46  ;;  %v1093_v11 = vpop.f32.mrb[38].mxu1  ;;  %2501 = vmatprep.mubr.bf16.mxu0 %v1515_v1 }
 0x1ad   :  { %v1094_v13 = vadd.f32 %v1093_v11, %v3811_v44  ;;  %v1095_v15 = vpop.f32.mrb[39].mxu1  ;;  %2502 = vmatmul.mubr.bf16.vlgmr.msra.gmra.mrb[0].mxu0 %v1514_v0  ;;  %v1402_v29 = vmax.f32 %v1090_v6, 0.0  ;;  %v3371_v11 = vld [vmem:[#allocation8 + $0x270] ss:$8 sps:$4 sm:$0xff]  }
 0x1ae   :  { %v1096_v14 = vadd.f32 %v1095_v15, %v3814_v46  ;;  %2583 = vmatpush1.bf16.msra.mxu0 %v3350_v4  ;;  %v1403_v22 = vmax.f32 %v1092_v10, 0.0 }
 0x1af   :  { %v1410_v21 = vmax.f32 %v1094_v13, 0.0  ;;  %2584 = vmatprep.subr.bf16.mxu0 %v3355_v9 }
 0x1b0   :  { %v1411_v31 = vmax.f32 %v1096_v14, 0.0  ;;  %v3376_v14 = vld [vmem:[#allocation8 + $0x284] ss:$8 sps:$4 sm:$0xff]  }
 0x1b1   :  { %v1522_v41 = vpack.c.bf16 %v1410_v21, %v1402_v29 }
 0x1b2   :  { %v1523_v23 = vpack.c.bf16 %v1411_v31, %v1403_v22  ;;  %v1099_v24 = vpop.f32.mrb[40].mxu1  ;;  %2585 = vmatpush1.bf16.msra.mxu0 %v3353_v27  ;;  %v3374_v31 = vld [vmem:[#allocation8 + $0x280] ss:$8 sps:$4 sm:$0xff]  }
 0x1b3   :  { %v1100_v28 = vadd.f32 %v1099_v24, %v3811_v44  ;;  %v1101_v30 = vpop.f32.mrb[41].mxu1  ;;  %2586 = vmatprep.subr.bf16.mxu0 %v3358_v26  ;;  %v3379_v24 = vld [vmem:[#allocation8 + $0x294] ss:$8 sps:$4 sm:$0xff]  }
 0x1b4   :  { %v1102_v43 = vadd.f32 %v1101_v30, %v3814_v46  ;;  %v1103_v33 = vpop.f32.mrb[42].mxu1  ;;  %2511 = vmatprep.mubr.bf16.mxu0 %v1523_v23 }
 0x1b5   :  { %v1104_v34 = vadd.f32 %v1103_v33, %v3811_v44  ;;  %v1105_v35 = vpop.f32.mrb[43].mxu1  ;;  %2512 = vmatmul.mubr.bf16.gmra.mrb[4].mxu0 %v1522_v41  ;;  %v1418_v38 = vmax.f32 %v1100_v28, 0.0  ;;  %v3377_v33 = vld [vmem:[#allocation8 + $0x290] ss:$8 sps:$4 sm:$0xff]  }
 0x1b6   :  { %v1106_v36 = vadd.f32 %v1105_v35, %v3814_v46  ;;  %2587 = vmatpush1.bf16.msra.mxu0 %v3356_v25  ;;  %v1419_v40 = vmax.f32 %v1102_v43, 0.0 }
 0x1b7   :  { %v1426_v39 = vmax.f32 %v1104_v34, 0.0  ;;  %2588 = vmatprep.subr.bf16.mxu0 %v3361_v32 }
 0x1b8   :  { %v1427_v51 = vmax.f32 %v1106_v36, 0.0  ;;  %v3382_v36 = vld [vmem:[#allocation8 + $0x2a4] ss:$8 sps:$4 sm:$0xff]  }
 0x1b9   :  { %v1530_v42 = vpack.c.bf16 %v1426_v39, %v1418_v38 }
 0x1ba   :  { %v1531_v55 = vpack.c.bf16 %v1427_v51, %v1419_v40  ;;  %v1109_v57 = vpop.f32.mrb[44].mxu1  ;;  %2589 = vmatpush1.bf16.msra.mxu0 %v3359_v37  ;;  %v3380_v51 = vld [vmem:[#allocation8 + $0x2a0] ss:$8 sps:$4 sm:$0xff]  }
 0x1bb   :  { %v1110_v47 = vadd.f32 %v1109_v57, %v3811_v44  ;;  %v1111_v20 = vpop.f32.mrb[45].mxu1  ;;  %2590 = vmatprep.subr.bf16.mxu0 %v3364_v48  ;;  %v3385_v57 = vld [vmem:[#allocation8 + $0x2b4] ss:$8 sps:$4 sm:$0xff]  }
 0x1bc   :  { %v1112_v50 = vadd.f32 %v1111_v20, %v3814_v46  ;;  %v1113_v12 = vpop.f32.mrb[46].mxu1  ;;  %2521 = vmatprep.mubr.bf16.mxu0 %v1531_v55 }
 0x1bd   :  { %v1114_v52 = vadd.f32 %v1113_v12, %v3811_v44  ;;  %v1115_v53 = vpop.f32.mrb[47].mxu1  ;;  %2522 = vmatmul.mubr.bf16.gmra.mrb[8].mxu0 %v1530_v42  ;;  %v1434_v58 = vmax.f32 %v1110_v47, 0.0  ;;  %v3383_v12 = vld [vmem:[#allocation8 + $0x2b0] ss:$8 sps:$4 sm:$0xff]  }
 0x1be   :  { %v1116_v54 = vadd.f32 %v1115_v53, %v3814_v46  ;;  %2591 = vmatpush1.bf16.msra.mxu0 %v3362_v45  ;;  %v1435_v60 = vmax.f32 %v1112_v50, 0.0 }
 0x1bf   :  { %v1442_v59 = vmax.f32 %v1114_v52, 0.0  ;;  %2592 = vmatprep.subr.bf16.mxu0 %v3367_v49 }
 0x1c0   :  { %v1443_v61 = vmax.f32 %v1116_v54, 0.0  ;;  %v3388_v54 = vld [vmem:[#allocation8 + $0x2c4] ss:$8 sps:$4 sm:$0xff]  }
 0x1c1   :  { %v1538_v62 = vpack.c.bf16 %v1442_v59, %v1434_v58 }
 0x1c2   :  { %v1539_v5 = vpack.c.bf16 %v1443_v61, %v1435_v60  ;;  %v1119_v63 = vpop.f32.mrb[48].mxu1  ;;  %2593 = vmatpush1.bf16.msra.mxu0 %v3365_v56  ;;  %v3386_v61 = vld [vmem:[#allocation8 + $0x2c0] ss:$8 sps:$4 sm:$0xff]  }
 0x1c3   :  { %v1120_v0 = vadd.f32 %v1119_v63, %v3811_v44  ;;  %v1121_v1 = vpop.f32.mrb[49].mxu1  ;;  %2594 = vmatprep.subr.bf16.mxu0 %v3370_v2  ;;  %v3391_v63 = vld [vmem:[#allocation8 + $0x2d4] ss:$8 sps:$4 sm:$0xff]  }
 0x1c4   :  { %v1122_v4 = vadd.f32 %v1121_v1, %v3814_v46  ;;  %v1123_v6 = vpop.f32.mrb[50].mxu1  ;;  %2531 = vmatprep.mubr.bf16.mxu0 %v1539_v5 }
 0x1c5   :  { %v1124_v7 = vadd.f32 %v1123_v6, %v3811_v44  ;;  %v1125_v9 = vpop.f32.mrb[51].mxu1  ;;  %2532 = vmatmul.mubr.bf16.gmra.mrb[12].mxu0 %v1538_v62  ;;  %v1450_v13 = vmax.f32 %v1120_v0, 0.0 }
 0x1c6   :  { %v1126_v10 = vadd.f32 %v1125_v9, %v3814_v46  ;;  %2595 = vmatpush1.bf16.msra.mxu0 %v3368_v8  ;;  %v1451_v27 = vmax.f32 %v1122_v4, 0.0  ;;  %v270_v8 = vsub.s32 4, %v3748_v16  ;;  %v3389_v9 = vld [vmem:[#allocation8 + $0x2d0] ss:$8 sps:$4 sm:$0xff]  }
 0x1c7   :  { %v1458_v15 = vmax.f32 %v1124_v7, 0.0  ;;  %2596 = vmatprep.subr.bf16.mxu0 %v3373_v3  ;;  %v274_v3 = vsub.s32 5, %v3748_v16 }
 0x1c8   :  { %v1459_v29 = vmax.f32 %v1126_v10, 0.0 }
 0x1c9   :  { %v1546_v21 = vpack.c.bf16 %v1458_v15, %v1450_v13  ;;  %v3851_v13 = vrot.slane %v3752_v18, %v270_v8  ;;  %v3394_v15 = vld [vmem:[#allocation8 + $0x2e4] ss:$8 sps:$4 sm:$0xff]  }
 0x1ca   :  { %v1547_v26 = vpack.c.bf16 %v1459_v29, %v1451_v27  ;;  %v1129_v22 = vpop.f32.mrb[52].mxu1  ;;  %2597 = vmatpush1.bf16.msra.mxu0 %v3371_v11  ;;  %v3854_v29 = vrot.slane %v3752_v18, %v274_v3 }
 0x1cb   :  { %v1130_v41 = vadd.f32 %v1129_v22, %v3811_v44  ;;  %v1131_v23 = vpop.f32.mrb[53].mxu1  ;;  %2598 = vmatprep.subr.bf16.mxu0 %v3376_v14  ;;  %v3392_v22 = vld [vmem:[#allocation8 + $0x2e0] ss:$8 sps:$4 sm:$0xff]  }
 0x1cc   :  { %v1132_v25 = vadd.f32 %v1131_v23, %v3814_v46  ;;  %v1133_v28 = vpop.f32.mrb[54].mxu1  ;;  %2541 = vmatprep.mubr.bf16.mxu0 %v1547_v26 }
 0x1cd   :  { %v1134_v30 = vadd.f32 %v1133_v28, %v3811_v44  ;;  %v1135_v32 = vpop.f32.mrb[55].mxu1  ;;  %2542 = vmatmul.mubr.bf16.gmra.mrb[16].mxu0 %v1546_v21  ;;  %v1466_v34 = vmax.f32 %v1130_v41, 0.0  ;;  %v3397_v41 = vld [vmem:[#allocation8 + $0x2f4] ss:$8 sps:$4 sm:$0xff]  }
 0x1ce   :  { %v1136_v43 = vadd.f32 %v1135_v32, %v3814_v46  ;;  %2599 = vmatpush1.bf16.msra.mxu0 %v3374_v31  ;;  %v1467_v37 = vmax.f32 %v1132_v25, 0.0 }
 0x1cf   :  { %v1474_v35 = vmax.f32 %v1134_v30, 0.0  ;;  %2600 = vmatprep.subr.bf16.mxu0 %v3379_v24  ;;  %v3395_v30 = vld [vmem:[#allocation8 + $0x2f0] ss:$8 sps:$4 sm:$0xff]  }
 0x1d0   :  { %v1475_v38 = vmax.f32 %v1136_v43, 0.0 }
 0x1d1   :  { %v1554_v39 = vpack.c.bf16 %v1474_v35, %v1466_v34 }
 0x1d2   :  { %v1555_v48 = vpack.c.bf16 %v1475_v38, %v1467_v37  ;;  %v1139_v40 = vpop.f32.mrb[56].mxu1  ;;  %2601 = vmatpush1.bf16.msra.mxu0 %v3377_v33  ;;  %v3400_v33 = vld [vmem:[#allocation8 + $0x304] ss:$8 sps:$4 sm:$0xff]  }
 0x1d3   :  { %v1140_v42 = vadd.f32 %v1139_v40, %v3811_v44  ;;  %v1141_v55 = vpop.f32.mrb[57].mxu1  ;;  %2602 = vmatprep.subr.bf16.mxu0 %v3382_v36 }
 0x1d4   :  { %v1142_v45 = vadd.f32 %v1141_v55, %v3814_v46  ;;  %v1143_v47 = vpop.f32.mrb[58].mxu1  ;;  %2551 = vmatprep.mubr.bf16.mxu0 %v1555_v48 }
 0x1d5   :  { %v1144_v20 = vadd.f32 %v1143_v47, %v3811_v44  ;;  %v1145_v49 = vpop.f32.mrb[59].mxu1  ;;  %2552 = vmatmul.mubr.bf16.gmra.mrb[20].mxu0 %v1554_v39  ;;  %v1482_v52 = vmax.f32 %v1140_v42, 0.0  ;;  %v3398_v39 = vld [vmem:[#allocation8 + $0x300] ss:$8 sps:$4 sm:$0xff]  }
 0x1d6   :  { %v1146_v50 = vadd.f32 %v1145_v49, %v3814_v46  ;;  %2603 = vmatpush1.bf16.msra.mxu0 %v3380_v51  ;;  %v1483_v56 = vmax.f32 %v1142_v45, 0.0  ;;  %v3403_v51 = vld [vmem:[#allocation8 + $0x314] ss:$8 sps:$4 sm:$0xff]  }
 0x1d7   :  { %v1490_v53 = vmax.f32 %v1144_v20, 0.0  ;;  %2604 = vmatprep.subr.bf16.mxu0 %v3385_v57  ;;  %v3401_v20 = vld [vmem:[#allocation8 + $0x310] ss:$8 sps:$4 sm:$0xff]  }
 0x1d8   :  { %v1491_v58 = vmax.f32 %v1146_v50, 0.0 }
 0x1d9   :  { %v1562_v59 = vpack.c.bf16 %v1490_v53, %v1482_v52 }
 0x1da   :  { %v1563_v2 = vpack.c.bf16 %v1491_v58, %v1483_v56  ;;  %v1149_v60 = vpop.f32.mrb[60].mxu1  ;;  %2605 = vmatpush1.bf16.msra.mxu0 %v3383_v12  ;;  %v3406_v12 = vld [vmem:[#allocation8 + $0x324] ss:$8 sps:$4 sm:$0xff]  }
 0x1db   :  { %v1150_v62 = vadd.f32 %v1149_v60, %v3811_v44  ;;  %v1151_v5 = vpop.f32.mrb[61].mxu1  ;;  %2606 = vmatprep.subr.bf16.mxu0 %v3388_v54 }
 0x1dc   :  { %v1152_v0 = vadd.f32 %v1151_v5, %v3814_v46  ;;  %v1153_v1 = vpop.f32.mrb[62].mxu1  ;;  %2561 = vmatprep.mubr.bf16.mxu0 %v1563_v2 }
 0x1dd   :  { %v1154_v4 = vadd.f32 %v1153_v1, %v3811_v44  ;;  %v1155_v6 = vpop.f32.mrb[63].mxu1  ;;  %2562 = vmatmul.mubr.bf16.gmra.mrb[24].mxu0 %v1562_v59  ;;  %v1498_v10 = vmax.f32 %v1150_v62, 0.0  ;;  %v3404_v59 = vld [vmem:[#allocation8 + $0x320] ss:$8 sps:$4 sm:$0xff]   ;;  %v3407_v1 = vld [vmem:[#allocation8 + $0x330] ss:$8 sps:$4 sm:$0xff]  }
 0x1de   :  { %v1156_v7 = vadd.f32 %v1155_v6, %v3814_v46  ;;  %2607 = vmatpush1.bf16.msra.mxu0 %v3386_v61  ;;  %v1499_v14 = vmax.f32 %v1152_v0, 0.0  ;;  %v3409_v61 = vld [vmem:[#allocation8 + $0x334] ss:$8 sps:$4 sm:$0xff]   ;;  %v3412_v6 = vld [vmem:[#allocation8 + $0x344] ss:$8 sps:$4 sm:$0xff]  }
 0x1df   :  { %v1506_v11 = vmax.f32 %v1154_v4, 0.0  ;;  %2608 = vmatprep.subr.bf16.mxu0 %v3391_v63 }
 0x1e0   :  { %v1507_v27 = vmax.f32 %v1156_v7, 0.0 }
 0x1e1   :  { %v1570_v21 = vpack.c.bf16 %v1506_v11, %v1498_v10 }
 0x1e2   :  { %v1571_v44 = vpack.c.bf16 %v1507_v27, %v1499_v14  ;;  %v1192_v26 = vpop.f32.mrb[64].mxu1  ;;  %2609 = vmatpush1.bf16.msra.mxu0 %v3389_v9  ;;  %v3410_v14 = vld [vmem:[#allocation8 + $0x340] ss:$8 sps:$4 sm:$0xff]  }
 0x1e3   :  { %v1193_v46 = vadd.f32 %v1192_v26, %v3851_v13  ;;  %v1194_v31 = vpop.f32.mrb[65].mxu1  ;;  %2610 = vmatprep.subr.bf16.mxu0 %v3394_v15 }
 0x1e4   :  { %v1195_v23 = vadd.f32 %v1194_v31, %v3854_v29  ;;  %v1196_v24 = vpop.f32.mrb[66].mxu1  ;;  %2571 = vmatprep.mubr.bf16.mxu0 %v1571_v44  ;;  %v3415_v44 = vld [vmem:[#allocation8 + $0x354] ss:$8 sps:$4 sm:$0xff]  }
 0x1e5   :  { %v1197_v25 = vadd.f32 %v1196_v24, %v3851_v13  ;;  %v1198_v28 = vpop.f32.mrb[67].mxu1  ;;  %2572 = vmatmul.mubr.bf16.gmra.mrb[28].mxu0 %v1570_v21  ;;  %v1388_v32 = vmax.f32 %v1193_v46, 0.0 }
 0x1e6   :  { %v1199_v18 = vadd.f32 %v1198_v28, %v3854_v29  ;;  %2611 = vmatpush1.bf16.msra.mxu0 %v3392_v22  ;;  %v1389_v34 = vmax.f32 %v1195_v23, 0.0  ;;  %v3413_v23 = vld [vmem:[#allocation8 + $0x350] ss:$8 sps:$4 sm:$0xff]   ;;  %v3418_v28 = vld [vmem:[#allocation8 + $0x364] ss:$8 sps:$4 sm:$0xff]  }
 0x1e7   :  { %v1396_v43 = vmax.f32 %v1197_v25, 0.0  ;;  %2612 = vmatprep.subr.bf16.mxu0 %v3397_v41 }
 0x1e8   :  { %v1397_v35 = vmax.f32 %v1199_v18, 0.0 }
 0x1e9   :  { %v1516_v36 = vpack.c.bf16 %v1396_v43, %v1388_v32 }
 0x1ea   :  { %v1517_v37 = vpack.c.bf16 %v1397_v35, %v1389_v34  ;;  %v1202_v38 = vpop.f32.mrb[68].mxu1  ;;  %2613 = vmatpush1.bf16.msra.mxu0 %v3395_v30  ;;  %v3416_v34 = vld [vmem:[#allocation8 + $0x360] ss:$8 sps:$4 sm:$0xff]  }
 0x1eb   :  { %v1203_v48 = vadd.f32 %v1202_v38, %v3851_v13  ;;  %v1204_v40 = vpop.f32.mrb[69].mxu1  ;;  %2695 = vmatprep.subr.bf16.mxu0 %v3400_v33 }
 0x1ec   :  { %v1205_v42 = vadd.f32 %v1204_v40, %v3854_v29  ;;  %v1206_v55 = vpop.f32.mrb[70].mxu1  ;;  %2614 = vmatprep.mubr.bf16.mxu0 %v1517_v37  ;;  %v3421_v37 = vld [vmem:[#allocation8 + $0x374] ss:$8 sps:$4 sm:$0xff]  }
 0x1ed   :  { %v1207_v57 = vadd.f32 %v1206_v55, %v3851_v13  ;;  %v1208_v45 = vpop.f32.mrb[71].mxu1  ;;  %2615 = vmatmul.mubr.bf16.vlgmr.msra.gmra.mrb[0].mxu0 %v1516_v36  ;;  %v1404_v49 = vmax.f32 %v1203_v48, 0.0 }
 0x1ee   :  { %v1209_v47 = vadd.f32 %v1208_v45, %v3854_v29  ;;  %2696 = vmatpush1.bf16.msra.mxu0 %v3398_v39  ;;  %v1405_v52 = vmax.f32 %v1205_v42, 0.0  ;;  %v3419_v42 = vld [vmem:[#allocation8 + $0x370] ss:$8 sps:$4 sm:$0xff]   ;;  %v3424_v45 = vld [vmem:[#allocation8 + $0x384] ss:$8 sps:$4 sm:$0xff]  }
 0x1ef   :  { %v1412_v50 = vmax.f32 %v1207_v57, 0.0  ;;  %2697 = vmatprep.subr.bf16.mxu0 %v3403_v51 }
 0x1f0   :  { %v1413_v53 = vmax.f32 %v1209_v47, 0.0 }
 0x1f1   :  { %v1524_v54 = vpack.c.bf16 %v1412_v50, %v1404_v49 }
 0x1f2   :  { %v1525_v56 = vpack.c.bf16 %v1413_v53, %v1405_v52  ;;  %v1212_v58 = vpop.f32.mrb[72].mxu1  ;;  %2698 = vmatpush1.bf16.msra.mxu0 %v3401_v20  ;;  %v3422_v52 = vld [vmem:[#allocation8 + $0x380] ss:$8 sps:$4 sm:$0xff]  }
 0x1f3   :  { %v1213_v2 = vadd.f32 %v1212_v58, %v3851_v13  ;;  %v1214_v60 = vpop.f32.mrb[73].mxu1  ;;  %2699 = vmatprep.subr.bf16.mxu0 %v3406_v12 }
 0x1f4   :  { %v1215_v62 = vadd.f32 %v1214_v60, %v3854_v29  ;;  %v1216_v5 = vpop.f32.mrb[74].mxu1  ;;  %2624 = vmatprep.mubr.bf16.mxu0 %v1525_v56  ;;  %v3427_v56 = vld [vmem:[#allocation8 + $0x394] ss:$8 sps:$4 sm:$0xff]  }
 0x1f5   :  { %v1217_v63 = vadd.f32 %v1216_v5, %v3851_v13  ;;  %v1218_v8 = vpop.f32.mrb[75].mxu1  ;;  %2625 = vmatmul.mubr.bf16.gmra.mrb[4].mxu0 %v1524_v54  ;;  %v1420_v3 = vmax.f32 %v1213_v2, 0.0 }
 0x1f6   :  { %v1219_v0 = vadd.f32 %v1218_v8, %v3854_v29  ;;  %2700 = vmatpush1.bf16.msra.mxu0 %v3404_v59  ;;  %v1421_v7 = vmax.f32 %v1215_v62, 0.0  ;;  %v3425_v62 = vld [vmem:[#allocation8 + $0x390] ss:$8 sps:$4 sm:$0xff]   ;;  %v3430_v8 = vld [vmem:[#allocation8 + $0x3a4] ss:$8 sps:$4 sm:$0xff]  }
 0x1f7   :  { %v1428_v4 = vmax.f32 %v1217_v63, 0.0  ;;  %2701 = vmatprep.subr.bf16.mxu0 %v3409_v61 }
 0x1f8   :  { %v1429_v9 = vmax.f32 %v1219_v0, 0.0 }
 0x1f9   :  { %v1532_v10 = vpack.c.bf16 %v1428_v4, %v1420_v3 }
 0x1fa   :  { %v1533_v11 = vpack.c.bf16 %v1429_v9, %v1421_v7  ;;  %v1222_v15 = vpop.f32.mrb[76].mxu1  ;;  %2702 = vmatpush1.bf16.msra.mxu0 %v3407_v1  ;;  %v3428_v7 = vld [vmem:[#allocation8 + $0x3a0] ss:$8 sps:$4 sm:$0xff]  }
 0x1fb   :  { %v1223_v27 = vadd.f32 %v1222_v15, %v3851_v13  ;;  %v1224_v21 = vpop.f32.mrb[77].mxu1  ;;  %2703 = vmatprep.subr.bf16.mxu0 %v3412_v6 }
 0x1fc   :  { %v1225_v26 = vadd.f32 %v1224_v21, %v3854_v29  ;;  %v1226_v22 = vpop.f32.mrb[78].mxu1  ;;  %2634 = vmatprep.mubr.bf16.mxu0 %v1533_v11  ;;  %v3433_v11 = vld [vmem:[#allocation8 + $0x3b4] ss:$8 sps:$4 sm:$0xff]  }
 0x1fd   :  { %v1227_v46 = vadd.f32 %v1226_v22, %v3851_v13  ;;  %v1228_v31 = vpop.f32.mrb[79].mxu1  ;;  %2635 = vmatmul.mubr.bf16.gmra.mrb[8].mxu0 %v1532_v10  ;;  %v1436_v24 = vmax.f32 %v1223_v27, 0.0 }
 0x1fe   :  { %v1229_v41 = vadd.f32 %v1228_v31, %v3854_v29  ;;  %2704 = vmatpush1.bf16.msra.mxu0 %v3410_v14  ;;  %v1437_v18 = vmax.f32 %v1225_v26, 0.0  ;;  %v3431_v26 = vld [vmem:[#allocation8 + $0x3b0] ss:$8 sps:$4 sm:$0xff]   ;;  %v3436_v31 = vld [vmem:[#allocation8 + $0x3c4] ss:$8 sps:$4 sm:$0xff]  }
 0x1ff   :  { %v1444_v25 = vmax.f32 %v1227_v46, 0.0  ;;  %2705 = vmatprep.subr.bf16.mxu0 %v3415_v44 }
 0x200   :  { %v1445_v30 = vmax.f32 %v1229_v41, 0.0 }
 0x201   :  { %v1540_v32 = vpack.c.bf16 %v1444_v25, %v1436_v24 }
 0x202   :  { %v1541_v43 = vpack.c.bf16 %v1445_v30, %v1437_v18  ;;  %v1232_v33 = vpop.f32.mrb[80].mxu1  ;;  %2706 = vmatpush1.bf16.msra.mxu0 %v3413_v23  ;;  %v3434_v18 = vld [vmem:[#allocation8 + $0x3c0] ss:$8 sps:$4 sm:$0xff]  }
 0x203   :  { %v1233_v35 = vadd.f32 %v1232_v33, %v3851_v13  ;;  %v1234_v36 = vpop.f32.mrb[81].mxu1  ;;  %2707 = vmatprep.subr.bf16.mxu0 %v3418_v28  ;;  %v278_v33 = vsub.s32 6, %v3748_v16 }
 0x204   :  { %v1235_v38 = vadd.f32 %v1234_v36, %v3854_v29  ;;  %v1236_v39 = vpop.f32.mrb[82].mxu1  ;;  %2644 = vmatprep.mubr.bf16.mxu0 %v1541_v43  ;;  %v3439_v43 = vld [vmem:[#allocation8 + $0x3d4] ss:$8 sps:$4 sm:$0xff]   ;;  %v282_v36 = vsub.s32 7, %v3748_v16 }
 0x205   :  { %v1237_v48 = vadd.f32 %v1236_v39, %v3851_v13  ;;  %v1238_v40 = vpop.f32.mrb[83].mxu1  ;;  %2645 = vmatmul.mubr.bf16.gmra.mrb[12].mxu0 %v1540_v32  ;;  %v1452_v55 = vmax.f32 %v1233_v35, 0.0 }
 0x206   :  { %v1239_v51 = vadd.f32 %v1238_v40, %v3854_v29  ;;  %2708 = vmatpush1.bf16.msra.mxu0 %v3416_v34  ;;  %v1453_v47 = vmax.f32 %v1235_v38, 0.0 }
 0x207   :  { %v1460_v57 = vmax.f32 %v1237_v48, 0.0  ;;  %2709 = vmatprep.subr.bf16.mxu0 %v3421_v37  ;;  %v3437_v48 = vld [vmem:[#allocation8 + $0x3d0] ss:$8 sps:$4 sm:$0xff]  }
 0x208   :  { %v1461_v20 = vmax.f32 %v1239_v51, 0.0 }
 0x209   :  { %v1548_v49 = vpack.c.bf16 %v1460_v57, %v1452_v55  ;;  %v3442_v57 = vld [vmem:[#allocation8 + $0x3e4] ss:$8 sps:$4 sm:$0xff]  }
 0x20a   :  { %v1549_v50 = vpack.c.bf16 %v1461_v20, %v1453_v47  ;;  %v1242_v12 = vpop.f32.mrb[84].mxu1  ;;  %2710 = vmatpush1.bf16.msra.mxu0 %v3419_v42  ;;  %v3446_v42 = vld [vmem:[#allocation7] sm:$0xff] }
 0x20b   :  { %v1243_v53 = vadd.f32 %v1242_v12, %v3851_v13  ;;  %v1244_v54 = vpop.f32.mrb[85].mxu1  ;;  %2711 = vmatprep.subr.bf16.mxu0 %v3424_v45  ;;  %v3890_v55 = vrot.slane %v3446_v42, %v278_v33  ;;  %v3892_v20 = vrot.slane %v3446_v42, %v282_v36  ;;  %v3440_v12 = vld [vmem:[#allocation8 + $0x3e0] ss:$8 sps:$4 sm:$0xff]  }
 0x20c   :  { %v1245_v58 = vadd.f32 %v1244_v54, %v3854_v29  ;;  %v1246_v59 = vpop.f32.mrb[86].mxu1  ;;  %2654 = vmatprep.mubr.bf16.mxu0 %v1549_v50 }
 0x20d   :  { %v1247_v2 = vadd.f32 %v1246_v59, %v3851_v13  ;;  %v1248_v60 = vpop.f32.mrb[87].mxu1  ;;  %2655 = vmatmul.mubr.bf16.gmra.mrb[16].mxu0 %v1548_v49  ;;  %v1468_v5 = vmax.f32 %v1243_v53, 0.0  ;;  %v3445_v53 = vld [vmem:[#allocation8 + $0x3f4] ss:$8 sps:$4 sm:$0xff]  }
 0x20e   :  { %v1249_v61 = vadd.f32 %v1248_v60, %v3854_v29  ;;  %2712 = vmatpush1.bf16.msra.mxu0 %v3422_v52  ;;  %v1469_v0 = vmax.f32 %v1245_v58, 0.0  ;;  %v3443_v60 = vld [vmem:[#allocation8 + $0x3f0] ss:$8 sps:$4 sm:$0xff]  }
 0x20f   :  { %v1476_v63 = vmax.f32 %v1247_v2, 0.0  ;;  %2713 = vmatprep.subr.bf16.mxu0 %v3427_v56 }
 0x210   :  { %v1477_v1 = vmax.f32 %v1249_v61, 0.0 }
 0x211   :  { %v1556_v3 = vpack.c.bf16 %v1476_v63, %v1468_v5 }
 0x212   :  { %v1557_v4 = vpack.c.bf16 %v1477_v1, %v1469_v0  ;;  %v1252_v6 = vpop.f32.mrb[88].mxu1  ;;  %2714 = vmatpush1.bf16.msra.mxu0 %v3425_v62 }
 0x213   :  { %v1253_v9 = vadd.f32 %v1252_v6, %v3851_v13  ;;  %v1254_v10 = vpop.f32.mrb[89].mxu1  ;;  %2715 = vmatprep.subr.bf16.mxu0 %v3430_v8 }
 0x214   :  { %v1255_v15 = vadd.f32 %v1254_v10, %v3854_v29  ;;  %v1256_v14 = vpop.f32.mrb[90].mxu1  ;;  %2664 = vmatprep.mubr.bf16.mxu0 %v1557_v4 }
 0x215   :  { %v1257_v27 = vadd.f32 %v1256_v14, %v3851_v13  ;;  %v1258_v21 = vpop.f32.mrb[91].mxu1  ;;  %2665 = vmatmul.mubr.bf16.gmra.mrb[20].mxu0 %v1556_v3  ;;  %v1484_v22 = vmax.f32 %v1253_v9, 0.0 }
 0x216   :  { %v1259_v44 = vadd.f32 %v1258_v21, %v3854_v29  ;;  %2716 = vmatpush1.bf16.msra.mxu0 %v3428_v7  ;;  %v1485_v41 = vmax.f32 %v1255_v15, 0.0 }
 0x217   :  { %v1492_v46 = vmax.f32 %v1257_v27, 0.0  ;;  %2717 = vmatprep.subr.bf16.mxu0 %v3433_v11 }
 0x218   :  { %v1493_v23 = vmax.f32 %v1259_v44, 0.0 }
 0x219   :  { %v1564_v24 = vpack.c.bf16 %v1492_v46, %v1484_v22 }
 0x21a   :  { %v1565_v25 = vpack.c.bf16 %v1493_v23, %v1485_v41  ;;  %v1262_v28 = vpop.f32.mrb[92].mxu1  ;;  %2718 = vmatpush1.bf16.msra.mxu0 %v3431_v26 }
 0x21b   :  { %v1263_v30 = vadd.f32 %v1262_v28, %v3851_v13  ;;  %v1264_v32 = vpop.f32.mrb[93].mxu1  ;;  %2719 = vmatprep.subr.bf16.mxu0 %v3436_v31 }
 0x21c   :  { %v1265_v34 = vadd.f32 %v1264_v32, %v3854_v29  ;;  %v1266_v35 = vpop.f32.mrb[94].mxu1  ;;  %2674 = vmatprep.mubr.bf16.mxu0 %v1565_v25 }
 0x21d   :  { %v1267_v37 = vadd.f32 %v1266_v35, %v3851_v13  ;;  %v1268_v38 = vpop.f32.mrb[95].mxu1  ;;  %2675 = vmatmul.mubr.bf16.gmra.mrb[24].mxu0 %v1564_v24  ;;  %v1500_v40 = vmax.f32 %v1263_v30, 0.0 }
 0x21e   :  { %v1269_v39 = vadd.f32 %v1268_v38, %v3854_v29  ;;  %2720 = vmatpush1.bf16.msra.mxu0 %v3434_v18  ;;  %v1501_v45 = vmax.f32 %v1265_v34, 0.0 }
 0x21f   :  { %v1508_v51 = vmax.f32 %v1267_v37, 0.0  ;;  %2721 = vmatprep.subr.bf16.mxu0 %v3439_v43 }
 0x220   :  { %v1509_v47 = vmax.f32 %v1269_v39, 0.0 }
 0x221   :  { %v1572_v49 = vpack.c.bf16 %v1508_v51, %v1500_v40 }
 0x222   :  { %v1573_v50 = vpack.c.bf16 %v1509_v47, %v1501_v45  ;;  %v1305_v13 = vpop.f32.mrb[96].mxu1  ;;  %2722 = vmatpush1.bf16.msra.mxu0 %v3437_v48 }
 0x223   :  { %v1306_v29 = vadd.f32 %v1305_v13, %v3890_v55  ;;  %v1307_v52 = vpop.f32.mrb[97].mxu1  ;;  %2723 = vmatprep.subr.bf16.mxu0 %v3442_v57 }
 0x224   :  { %v1308_v54 = vadd.f32 %v1307_v52, %v3892_v20  ;;  %v1309_v56 = vpop.f32.mrb[98].mxu1  ;;  %2684 = vmatprep.mubr.bf16.mxu0 %v1573_v50 }
 0x225   :  { %v1310_v58 = vadd.f32 %v1309_v56, %v3890_v55  ;;  %v1311_v59 = vpop.f32.mrb[99].mxu1  ;;  %2685 = vmatmul.mubr.bf16.gmra.mrb[28].mxu0 %v1572_v49  ;;  %v1390_v61 = vmax.f32 %v1306_v29, 0.0 }
 0x226   :  { %v1312_v2 = vadd.f32 %v1311_v59, %v3892_v20  ;;  %2724 = vmatpush1.bf16.msra.mxu0 %v3440_v12  ;;  %v1391_v5 = vmax.f32 %v1308_v54, 0.0 }
 0x227   :  { %v1398_v62 = vmax.f32 %v1310_v58, 0.0  ;;  %2725 = vmatprep.subr.bf16.mxu0 %v3445_v53 }
 0x228   :  { %v1399_v63 = vmax.f32 %v1312_v2, 0.0 }
 0x229   :  { %v1518_v8 = vpack.c.bf16 %v1398_v62, %v1390_v61 }
 0x22a   :  { %v1519_v0 = vpack.c.bf16 %v1399_v63, %v1391_v5  ;;  %v1315_v1 = vpop.f32.mrb[100].mxu1  ;;  %2726 = vmatpush1.bf16.msra.mxu0 %v3443_v60 }
 0x22b   :  { %v1316_v3 = vadd.f32 %v1315_v1, %v3890_v55  ;;  %v1317_v4 = vpop.f32.mrb[101].mxu1 }
 0x22c   :  { %v1318_v6 = vadd.f32 %v1317_v4, %v3892_v20  ;;  %v1319_v7 = vpop.f32.mrb[102].mxu1  ;;  %2727 = vmatprep.mubr.bf16.mxu0 %v1519_v0 }
 0x22d   :  { %v1320_v9 = vadd.f32 %v1319_v7, %v3890_v55  ;;  %v1321_v10 = vpop.f32.mrb[103].mxu1  ;;  %2728 = vmatmul.mubr.bf16.vlgmr.msra.gmra.mrb[0].mxu0 %v1518_v8  ;;  %v1406_v15 = vmax.f32 %v1316_v3, 0.0 }
 0x22e   :  { %v1322_v11 = vadd.f32 %v1321_v10, %v3892_v20  ;;  %v1407_v27 = vmax.f32 %v1318_v6, 0.0 }
 0x22f   :  { %v1414_v14 = vmax.f32 %v1320_v9, 0.0 }
 0x230   :  { %v1415_v21 = vmax.f32 %v1322_v11, 0.0 }
 0x231   :  { %v1526_v44 = vpack.c.bf16 %v1414_v14, %v1406_v15 }
 0x232   :  { %v1527_v26 = vpack.c.bf16 %v1415_v21, %v1407_v27  ;;  %v1325_v22 = vpop.f32.mrb[104].mxu1 }
 0x233   :  { %v1326_v46 = vadd.f32 %v1325_v22, %v3890_v55  ;;  %v1327_v31 = vpop.f32.mrb[105].mxu1 }
 0x234   :  { %v1328_v41 = vadd.f32 %v1327_v31, %v3892_v20  ;;  %v1329_v23 = vpop.f32.mrb[106].mxu1  ;;  %2737 = vmatprep.mubr.bf16.mxu0 %v1527_v26 }
 0x235   :  { %v1330_v24 = vadd.f32 %v1329_v23, %v3890_v55  ;;  %v1331_v25 = vpop.f32.mrb[107].mxu1  ;;  %2738 = vmatmul.mubr.bf16.gmra.mrb[4].mxu0 %v1526_v44  ;;  %v1422_v18 = vmax.f32 %v1326_v46, 0.0 }
 0x236   :  { %v1332_v28 = vadd.f32 %v1331_v25, %v3892_v20  ;;  %v1423_v32 = vmax.f32 %v1328_v41, 0.0 }
 0x237   :  { %v1430_v30 = vmax.f32 %v1330_v24, 0.0 }
 0x238   :  { %v1431_v43 = vmax.f32 %v1332_v28, 0.0 }
 0x239   :  { %v1534_v33 = vpack.c.bf16 %v1430_v30, %v1422_v18 }
 0x23a   :  { %v1535_v34 = vpack.c.bf16 %v1431_v43, %v1423_v32  ;;  %v1335_v35 = vpop.f32.mrb[108].mxu1 }
 0x23b   :  { %v1336_v36 = vadd.f32 %v1335_v35, %v3890_v55  ;;  %v1337_v37 = vpop.f32.mrb[109].mxu1 }
 0x23c   :  { %v1338_v38 = vadd.f32 %v1337_v37, %v3892_v20  ;;  %v1339_v39 = vpop.f32.mrb[110].mxu1  ;;  %2747 = vmatprep.mubr.bf16.mxu0 %v1535_v34 }
 0x23d   :  { %v1340_v48 = vadd.f32 %v1339_v39, %v3890_v55  ;;  %v1341_v40 = vpop.f32.mrb[111].mxu1  ;;  %2748 = vmatmul.mubr.bf16.gmra.mrb[8].mxu0 %v1534_v33  ;;  %v1438_v42 = vmax.f32 %v1336_v36, 0.0 }
 0x23e   :  { %v1342_v51 = vadd.f32 %v1341_v40, %v3892_v20  ;;  %v1439_v45 = vmax.f32 %v1338_v38, 0.0 }
 0x23f   :  { %v1446_v57 = vmax.f32 %v1340_v48, 0.0 }
 0x240   :  { %v1447_v47 = vmax.f32 %v1342_v51, 0.0 }
 0x241   :  { %v1542_v49 = vpack.c.bf16 %v1446_v57, %v1438_v42 }
 0x242   :  { %v1543_v50 = vpack.c.bf16 %v1447_v47, %v1439_v45  ;;  %v1345_v13 = vpop.f32.mrb[112].mxu1  ;;  %v1704_v47 = vld [vmem:[%s3988_s4] sm:$0x3]  ;;  %s3575_s4 = smov [#allocation10]  }
 0x243   :  { %v1346_v12 = vadd.f32 %v1345_v13, %v3890_v55  ;;  %v1347_v29 = vpop.f32.mrb[113].mxu1  ;;  %s2845_s21 = sshll.u32 %s3575_s4, 4  ;;  %s2846_s21 = int_to_ptr.vmem [resolvable:$true] %s2845_s21 }
 0x244   :  { %v1348_v52 = vadd.f32 %v1347_v29, %v3892_v20  ;;  %v1349_v53 = vpop.f32.mrb[114].mxu1  ;;  %2757 = vmatprep.mubr.bf16.mxu0 %v1543_v50  ;;  %s3535_s22 = scalar_lea.vmem %s2846_s21, 4096  ;;  %p3540_p5 = scmp.lt.s32.totalorder %s2846_s21, %s2846_s21 }
 0x245   :  { %v1350_v54 = vadd.f32 %v1349_v53, %v3890_v55  ;;  %v1351_v56 = vpop.f32.mrb[115].mxu1  ;;  %2758 = vmatmul.mubr.bf16.gmra.mrb[12].mxu0 %v1542_v49  ;;  %v1454_v59 = vmax.f32 %v1346_v12, 0.0  ;;  %v3931_v49 = vrot.slane %v1704_v47, %v254_v17  ;;  %p3536_p4 = scmp.ne.s32.totalorder %s2846_s21, %s3535_s22  ;;  %p3541_p6 = scmp.lt.s32.totalorder %s3535_s22, %s3535_s22 }
 0x246   :  { %v1352_v58 = vadd.f32 %v1351_v56, %v3892_v20  ;;  %v1455_v60 = vmax.f32 %v1348_v52, 0.0 }
 0x247   :  { %v1462_v2 = vmax.f32 %v1350_v54, 0.0  ;;  %p3542_p7 = por %p3541_p6, %p3540_p5 }
 0x248   :  { %v1463_v61 = vmax.f32 %v1352_v58, 0.0 }
 0x249   :  { %v1550_v62 = vpack.c.bf16 %v1462_v2, %v1454_v59  ;;  %p3543_p8 = pnand %p3542_p7, %p3536_p4 }
 0x24a   :  { %v1551_v5 = vpack.c.bf16 %v1463_v61, %v1455_v60  ;;  %v1355_v63 = vpop.f32.mrb[116].mxu1 }
 0x24b   :  { %v1356_v8 = vadd.f32 %v1355_v63, %v3890_v55  ;;  %v1357_v0 = vpop.f32.mrb[117].mxu1 }
 0x24c   :  { %v1358_v1 = vadd.f32 %v1357_v0, %v3892_v20  ;;  %v1359_v3 = vpop.f32.mrb[118].mxu1  ;;  %2767 = vmatprep.mubr.bf16.mxu0 %v1551_v5 }
 0x24d   :  { %v1360_v4 = vadd.f32 %v1359_v3, %v3890_v55  ;;  %v1361_v6 = vpop.f32.mrb[119].mxu1  ;;  %2768 = vmatmul.mubr.bf16.gmra.mrb[16].mxu0 %v1550_v62  ;;  %v1470_v9 = vmax.f32 %v1356_v8, 0.0 }
 0x24e   :  { %v1362_v7 = vadd.f32 %v1361_v6, %v3892_v20  ;;  %v1471_v11 = vmax.f32 %v1358_v1, 0.0 }
 0x24f   :  { %v1478_v10 = vmax.f32 %v1360_v4, 0.0 }
 0x250   :  { %v1479_v15 = vmax.f32 %v1362_v7, 0.0 }
 0x251   :  { %v1558_v14 = vpack.c.bf16 %v1478_v10, %v1470_v9 }
 0x252   :  { %v1559_v27 = vpack.c.bf16 %v1479_v15, %v1471_v11  ;;  %v1365_v21 = vpop.f32.mrb[120].mxu1 }
 0x253   :  { %v1366_v44 = vadd.f32 %v1365_v21, %v3890_v55  ;;  %v1367_v26 = vpop.f32.mrb[121].mxu1 }
 0x254   :  { %v1368_v22 = vadd.f32 %v1367_v26, %v3892_v20  ;;  %v1369_v46 = vpop.f32.mrb[122].mxu1  ;;  %2777 = vmatprep.mubr.bf16.mxu0 %v1559_v27 }
 0x255   :  { %v1370_v31 = vadd.f32 %v1369_v46, %v3890_v55  ;;  %v1371_v41 = vpop.f32.mrb[123].mxu1  ;;  %2778 = vmatmul.mubr.bf16.gmra.mrb[20].mxu0 %v1558_v14  ;;  %v1486_v24 = vmax.f32 %v1366_v44, 0.0 }
 0x256   :  { %v1372_v23 = vadd.f32 %v1371_v41, %v3892_v20  ;;  %v1487_v28 = vmax.f32 %v1368_v22, 0.0 }
 0x257   :  { %v1494_v25 = vmax.f32 %v1370_v31, 0.0 }
 0x258   :  { %v1495_v18 = vmax.f32 %v1372_v23, 0.0 }
 0x259   :  { %v1566_v30 = vpack.c.bf16 %v1494_v25, %v1486_v24 }
 0x25a   :  { %v1567_v32 = vpack.c.bf16 %v1495_v18, %v1487_v28  ;;  %v1375_v43 = vpop.f32.mrb[124].mxu1 }
 0x25b   :  { %v1376_v33 = vadd.f32 %v1375_v43, %v3890_v55  ;;  %v1377_v34 = vpop.f32.mrb[125].mxu1 }
 0x25c   :  { %v1378_v35 = vadd.f32 %v1377_v34, %v3892_v20  ;;  %v1379_v36 = vpop.f32.mrb[126].mxu1  ;;  %2787 = vmatprep.mubr.bf16.mxu0 %v1567_v32 }
 0x25d   :  { %v1380_v37 = vadd.f32 %v1379_v36, %v3890_v55  ;;  %v1381_v38 = vpop.f32.mrb[127].mxu1  ;;  %2788 = vmatmul.mubr.bf16.gmra.mrb[24].mxu0 %v1566_v30  ;;  %v1502_v48 = vmax.f32 %v1376_v33, 0.0  ;;  %v3935_v55 = vrot.slane %v1704_v47, %v258_v19 }
 0x25e   :  { %v1382_v39 = vadd.f32 %v1381_v38, %v3892_v20  ;;  %v1503_v51 = vmax.f32 %v1378_v35, 0.0 }
 0x25f   :  { %v1510_v40 = vmax.f32 %v1380_v37, 0.0 }
 0x260   :  { %v1511_v42 = vmax.f32 %v1382_v39, 0.0 }
 0x261   :  { %v1574_v57 = vpack.c.bf16 %v1510_v40, %v1502_v48 }
 0x262   :  { %v1575_v45 = vpack.c.bf16 %v1511_v42, %v1503_v51 }
 0x264   :  { %2797 = vmatprep.mubr.bf16.mxu0 %v1575_v45 }
 0x265   :  { %2798 = vmatmul.mubr.bf16.gmra.mrb[28].mxu0 %v1574_v57 }
 0x300   :  { %v2729_v20 = vpop.f32.mrb[0].mxu0 }
 0x301   :  { %v3115_v50 = vadd.f32 %v2729_v20, %v3931_v49  ;;  %v2731_v13 = vpop.f32.mrb[1].mxu0 }
 0x302   :  { %v3116_v12 = vadd.f32 %v2731_v13, %v3935_v55  ;;  %v2733_v29 = vpop.f32.mrb[2].mxu0 }
 0x303   :  { %2808 = vst [vmem:[#allocation10] sm:$0xff] %v3115_v50  ;;  %v3117_v52 = vadd.f32 %v2733_v29, %v3931_v49  ;;  %v2735_v53 = vpop.f32.mrb[3].mxu0 }
 0x304   :  { %2809 = vst [vmem:[#allocation10 + $0x8] sm:$0xff] %v3116_v12  ;;  %v3118_v54 = vadd.f32 %v2735_v53, %v3935_v55 }
 0x305   :  { %2810 = vst [vmem:[#allocation10 + $0x10] sm:$0xff] %v3117_v52 }
 0x306   :  { %2811 = vst [vmem:[#allocation10 + $0x18] sm:$0xff] %v3118_v54 }
 0x308   :  { %v2739_v17 = vpop.f32.mrb[4].mxu0 }
 0x309   :  { %v3119_v16 = vadd.f32 %v2739_v17, %v3931_v49  ;;  %v2741_v19 = vpop.f32.mrb[5].mxu0 }
 0x30a   :  { %v3120_v56 = vadd.f32 %v2741_v19, %v3935_v55  ;;  %v2743_v58 = vpop.f32.mrb[6].mxu0 }
 0x30b   :  { %2812 = vst [vmem:[#allocation10 + $0x20] sm:$0xff] %v3119_v16  ;;  %v3121_v59 = vadd.f32 %v2743_v58, %v3931_v49  ;;  %v2745_v2 = vpop.f32.mrb[7].mxu0 }
 0x30c   :  { %2813 = vst [vmem:[#allocation10 + $0x28] sm:$0xff] %v3120_v56  ;;  %v3122_v60 = vadd.f32 %v2745_v2, %v3935_v55 }
 0x30d   :  { %2814 = vst [vmem:[#allocation10 + $0x30] sm:$0xff] %v3121_v59 }
 0x30e   :  { %2815 = vst [vmem:[#allocation10 + $0x38] sm:$0xff] %v3122_v60 }
 0x310   :  { %v2749_v61 = vpop.f32.mrb[8].mxu0 }
 0x311   :  { %v3123_v62 = vadd.f32 %v2749_v61, %v3931_v49  ;;  %v2751_v5 = vpop.f32.mrb[9].mxu0 }
 0x312   :  { %v3124_v63 = vadd.f32 %v2751_v5, %v3935_v55  ;;  %v2753_v8 = vpop.f32.mrb[10].mxu0 }
 0x313   :  { %2816 = vst [vmem:[#allocation10 + $0x40] sm:$0xff] %v3123_v62  ;;  %v3125_v0 = vadd.f32 %v2753_v8, %v3931_v49  ;;  %v2755_v1 = vpop.f32.mrb[11].mxu0 }
 0x314   :  { %2817 = vst [vmem:[#allocation10 + $0x48] sm:$0xff] %v3124_v63  ;;  %v3126_v3 = vadd.f32 %v2755_v1, %v3935_v55 }
 0x315   :  { %2818 = vst [vmem:[#allocation10 + $0x50] sm:$0xff] %v3125_v0 }
 0x316   :  { %2819 = vst [vmem:[#allocation10 + $0x58] sm:$0xff] %v3126_v3 }
 0x318   :  { %v2759_v4 = vpop.f32.mrb[12].mxu0 }
 0x319   :  { %v3127_v6 = vadd.f32 %v2759_v4, %v3931_v49  ;;  %v2761_v7 = vpop.f32.mrb[13].mxu0 }
 0x31a   :  { %v3128_v9 = vadd.f32 %v2761_v7, %v3935_v55  ;;  %v2763_v10 = vpop.f32.mrb[14].mxu0 }
 0x31b   :  { %2820 = vst [vmem:[#allocation10 + $0x60] sm:$0xff] %v3127_v6  ;;  %v3129_v11 = vadd.f32 %v2763_v10, %v3931_v49  ;;  %v2765_v15 = vpop.f32.mrb[15].mxu0 }
 0x31c   :  { %2821 = vst [vmem:[#allocation10 + $0x68] sm:$0xff] %v3128_v9  ;;  %v3130_v14 = vadd.f32 %v2765_v15, %v3935_v55 }
 0x31d   :  { %2822 = vst [vmem:[#allocation10 + $0x70] sm:$0xff] %v3129_v11 }
 0x31e   :  { %2823 = vst [vmem:[#allocation10 + $0x78] sm:$0xff] %v3130_v14 }
 0x320   :  { %v2769_v27 = vpop.f32.mrb[16].mxu0 }
 0x321   :  { %v3131_v21 = vadd.f32 %v2769_v27, %v3931_v49  ;;  %v2771_v44 = vpop.f32.mrb[17].mxu0 }
 0x322   :  { %v3132_v26 = vadd.f32 %v2771_v44, %v3935_v55  ;;  %v2773_v22 = vpop.f32.mrb[18].mxu0 }
 0x323   :  { %2824 = vst [vmem:[#allocation10 + $0x80] sm:$0xff] %v3131_v21  ;;  %v3133_v46 = vadd.f32 %v2773_v22, %v3931_v49  ;;  %v2775_v31 = vpop.f32.mrb[19].mxu0 }
 0x324   :  { %2825 = vst [vmem:[#allocation10 + $0x88] sm:$0xff] %v3132_v26  ;;  %v3134_v41 = vadd.f32 %v2775_v31, %v3935_v55 }
 0x325   :  { %2826 = vst [vmem:[#allocation10 + $0x90] sm:$0xff] %v3133_v46 }
 0x326   :  { %2827 = vst [vmem:[#allocation10 + $0x98] sm:$0xff] %v3134_v41 }
 0x328   :  { %v2779_v23 = vpop.f32.mrb[20].mxu0 }
 0x329   :  { %v3135_v24 = vadd.f32 %v2779_v23, %v3931_v49  ;;  %v2781_v25 = vpop.f32.mrb[21].mxu0 }
 0x32a   :  { %v3136_v28 = vadd.f32 %v2781_v25, %v3935_v55  ;;  %v2783_v18 = vpop.f32.mrb[22].mxu0 }
 0x32b   :  { %2828 = vst [vmem:[#allocation10 + $0xa0] sm:$0xff] %v3135_v24  ;;  %v3137_v30 = vadd.f32 %v2783_v18, %v3931_v49  ;;  %v2785_v32 = vpop.f32.mrb[23].mxu0 }
 0x32c   :  { %2829 = vst [vmem:[#allocation10 + $0xa8] sm:$0xff] %v3136_v28  ;;  %v3138_v43 = vadd.f32 %v2785_v32, %v3935_v55 }
 0x32d   :  { %2830 = vst [vmem:[#allocation10 + $0xb0] sm:$0xff] %v3137_v30 }
 0x32e   :  { %2831 = vst [vmem:[#allocation10 + $0xb8] sm:$0xff] %v3138_v43 }
 0x330   :  { %v2789_v33 = vpop.f32.mrb[24].mxu0 }
 0x331   :  { %v3139_v34 = vadd.f32 %v2789_v33, %v3931_v49  ;;  %v2791_v35 = vpop.f32.mrb[25].mxu0 }
 0x332   :  { %v3140_v36 = vadd.f32 %v2791_v35, %v3935_v55  ;;  %v2793_v37 = vpop.f32.mrb[26].mxu0 }
 0x333   :  { %2832 = vst [vmem:[#allocation10 + $0xc0] sm:$0xff] %v3139_v34  ;;  %v3141_v38 = vadd.f32 %v2793_v37, %v3931_v49  ;;  %v2795_v39 = vpop.f32.mrb[27].mxu0 }
 0x334   :  { %2833 = vst [vmem:[#allocation10 + $0xc8] sm:$0xff] %v3140_v36  ;;  %v3142_v48 = vadd.f32 %v2795_v39, %v3935_v55 }
 0x335   :  { %2834 = vst [vmem:[#allocation10 + $0xd0] sm:$0xff] %v3141_v38 }
 0x336   :  { %2835 = vst [vmem:[#allocation10 + $0xd8] sm:$0xff] %v3142_v48 }
 0x338   :  { %v2799_v40 = vpop.f32.mrb[28].mxu0 }
 0x339   :  { %v3143_v51 = vadd.f32 %v2799_v40, %v3931_v49  ;;  %v2801_v42 = vpop.f32.mrb[29].mxu0 }
 0x33a   :  { %v3144_v57 = vadd.f32 %v2801_v42, %v3935_v55  ;;  %v2803_v45 = vpop.f32.mrb[30].mxu0 }
 0x33b   :  { %2836 = vst [vmem:[#allocation10 + $0xe0] sm:$0xff] %v3143_v51  ;;  %v3145_v47 = vadd.f32 %v2803_v45, %v3931_v49  ;;  %v2805_v20 = vpop.f32.mrb[31].mxu0 }
 0x33c   :  { %2837 = vst [vmem:[#allocation10 + $0xe8] sm:$0xff] %v3144_v57  ;;  %v3146_v50 = vadd.f32 %v2805_v20, %v3935_v55 }
 0x33d   :  { %2838 = vst [vmem:[#allocation10 + $0xf0] sm:$0xff] %v3145_v47 }
 0x33e   :  { %2839 = vst [vmem:[#allocation10 + $0xf8] sm:$0xff] %v3146_v50 }
 0x33f   :  { %3546 = shalt.err (!%p3543_p8)
}
 0x340   :  { %s3547_s25 = scalar_lea.hbm %s3989_s5, 4096 }
 0x341   :  { %p3548_p9 = scmp.ne.s32.totalorder %s3989_s5, %s3547_s25  ;;  %p3551_p10 = scmp.lt.u32.totalorder %s3547_s25, %s3989_s5 }
 0x343   :  { %p3553_p11 = pnand %p3551_p10, %p3548_p9 }
 0x345   :  { %3556 = shalt.err (!%p3553_p11)
}
 0x346   :  { %2851 = dma.vmem_to_hbm [thread:$0]  %s2846_s21, 4096, %s3989_s5, [#allocation4], %s3569_s1, %s3569_s1, %s3570_s17  }
 0x347   :  { %3563 = dma.done.wait [#allocation4], 4096  }
 0x348   :  { %3564 = vsyncadd [#allocation4], 4294963200 }
 0x349   :  { %2855 = vsyncpa [#allocation3], 1 }
 0x34a   :  { %2856 = vsyncpa [#allocation6], 1 }
 0x34b   :  { %2857 = vsyncpa [#allocation9], 1 }
 0x34c   :  { %2858 = vsyncpa [#allocation4], 1 }

</bundles_post_ra>
